<compile_context>
chip_gen: v6e
topology: v6e:2x2x1
jax: 0.10.0
libtpu: 0.0.40
codegen_flags: <defaults>
</compile_context>

<pallas_src>
import jax
import jax.numpy as jnp
from jax import lax
from jax.experimental import pallas as pl
from jax.experimental.pallas import tpu as pltpu

# ---- problem sizes (consistent with SKConv defaults: M=2, G=32, r=2, L=32) ----
N, C, H, W = 2, 64, 16, 16
M, G, r, L = 2, 32, 2, 32
D = max(C // r, L)              # = 32
CPG = C // G                    # channels per group = 2
PAD = M                         # max padding/dilation over branches (= 2)
HP, WP = H + 2 * PAD, W + 2 * PAD
HW = H * W
K9C = 9 * C                     # per-branch im2col contraction length = 576
KTOT = M * K9C                  # fused (block-diagonal) contraction = 1152
MC = M * C                      # fused output rows = 128

assert M == 2, "kernel specializes the softmax / block-diag fusion to M == 2"


def skconv_kernel(p_ref, w_ref, bnb_ref, wc_ref, bc_ref, out_ref, fea_ref):
    # p_ref   : (1, M*9C, HW)  K-stacked im2col patches for this batch item
    # w_ref   : (M*C, M*9C)    block-diagonal conv taps, BN scale pre-folded
    # bnb_ref : (M*C, 1)       folded BN bias
    # wc_ref  : (M*C, C)       fused fc->fcs weight
    # bc_ref  : (M*C, 1)       fused fc->fcs bias
    # out_ref : (1, C, HW)
    # fea_ref : VMEM scratch (M*C, HW) holding both branch features

    # one MXU call for both branches: (128, 1152) x (1152, 256) -> (128, 256)
    conv = jnp.dot(w_ref[...], p_ref[0], preferred_element_type=jnp.float32)
    fea = jnp.maximum(conv + bnb_ref[...], 0.0)                 # BN bias + ReLU
    fea_ref[...] = fea                                          # park in VMEM

    # global average pool of fea_U = fea0 + fea1  (single lane-reduce)
    s = jnp.sum(fea, axis=1, keepdims=True)                     # (2C, 1)
    fea_s = (s[0:C] + s[C:2 * C]) * (1.0 / HW)                  # (C, 1)

    # fused fc -> fcs: one (128, 64) @ (64, 1) dot replaces three matvecs
    logits = jnp.dot(wc_ref[...], fea_s,
                     preferred_element_type=jnp.float32) + bc_ref[...]  # (2C, 1)

    # closed-form 2-way softmax (no concat, no cross-sublane reductions)
    a1 = 1.0 / (1.0 + jnp.exp(logits[0:C] - logits[C:2 * C]))   # (C, 1)
    a0 = 1.0 - a1

    # attention-weighted combine; fea slices reloaded from scratch (aligned)
    out_ref[0] = a0 * fea_ref[0:C, :] + a1 * fea_ref[C:2 * C, :]


def _im2col(x_pad):
    """x_pad: (N, C, HP, WP) -> patches (N, M*9C, HW).

    K index = m*9C + tap*C + cin (branch-major, then tap-major), matching the
    block-diagonal weight layout.
    """
    branches = []
    for m in range(M):
        dil = 1 + m
        taps = []
        for kh in range(3):
            for kw in range(3):
                oh = kh * dil + (PAD - dil)
                ow = kw * dil + (PAD - dil)
                taps.append(x_pad[:, :, oh:oh + H, ow:ow + W].reshape(N, C, HW))
        branches.append(jnp.concatenate(taps, axis=1))           # (N, 9C, HW)
    return jnp.concatenate(branches, axis=1)                     # (N, M*9C, HW)


@jax.jit
def skconv_forward(x_nchw, w_bd, bn_bias_col, w_comb, b_comb):
    x_pad = jnp.pad(x_nchw, ((0, 0), (0, 0), (PAD, PAD), (PAD, PAD)))
    patches = _im2col(x_pad)                                     # (N, M*9C, HW)

    out_ncp = pl.pallas_call(
        skconv_kernel,
        out_shape=jax.ShapeDtypeStruct((N, C, HW), jnp.float32),
        grid_spec=pltpu.PrefetchScalarGridSpec(
            num_scalar_prefetch=0,
            grid=(N,),
            in_specs=[
                pl.BlockSpec((1, KTOT, HW), lambda n: (n, 0, 0)),  # patches
                pl.BlockSpec((MC, KTOT), lambda n: (0, 0)),        # block-diag taps
                pl.BlockSpec((MC, 1), lambda n: (0, 0)),           # bn bias
                pl.BlockSpec((MC, C), lambda n: (0, 0)),           # fused fc->fcs W
                pl.BlockSpec((MC, 1), lambda n: (0, 0)),           # fused fc->fcs b
            ],
            out_specs=pl.BlockSpec((1, C, HW), lambda n: (n, 0, 0)),
            scratch_shapes=[pltpu.VMEM((MC, HW), jnp.float32)],
        ),
        compiler_params=pltpu.CompilerParams(
            dimension_semantics=("parallel",)),
    )(patches, w_bd, bn_bias_col, w_comb, b_comb)

    return out_ncp.reshape(N, C, H, W)                           # NCHW, no transpose


def reference(x, conv_w, bn_scale, bn_bias, fc_w, fc_b, fcs_w, fcs_b):
    feas = []
    for m in range(M):
        dil = 1 + m
        y = lax.conv_general_dilated(
            x, conv_w[m], window_strides=(1, 1),
            padding=((dil, dil), (dil, dil)),
            rhs_dilation=(dil, dil),
            dimension_numbers=('NCHW', 'OIHW', 'NCHW'),
            feature_group_count=G)
        y = y * bn_scale[m][None, :, None, None] + bn_bias[m][None, :, None, None]
        feas.append(jnp.maximum(y, 0.0))
    feas = jnp.stack(feas, axis=1)                       # (N, M, C, H, W)
    fea_U = feas.sum(axis=1)
    fea_s = fea_U.mean(axis=(-1, -2))                    # (N, C)
    fea_z = fea_s @ fc_w + fc_b                          # (N, D)
    logits = jnp.stack([fea_z @ fcs_w[m] + fcs_b[m] for m in range(M)], axis=1)
    attn = jax.nn.softmax(logits, axis=1)                # (N, M, C)
    return (feas * attn[:, :, :, None, None]).sum(axis=1)


if __name__ == "__main__":
    key = jax.random.PRNGKey(0)
    ks = jax.random.split(key, 9)

    # deterministic synthetic parameters (shapes per SKConv.__init__)
    conv_w = jax.random.normal(ks[0], (M, C, CPG, 3, 3), jnp.float32) * 0.2
    gamma = 1.0 + 0.1 * jax.random.normal(ks[1], (M, C), jnp.float32)
    beta = 0.1 * jax.random.normal(ks[2], (M, C), jnp.float32)
    run_mean = 0.05 * jax.random.normal(ks[3], (M, C), jnp.float32)
    run_var = 1.0 + 0.5 * jax.random.uniform(ks[4], (M, C), jnp.float32)
    eps = 1e-5
    bn_scale = gamma / jnp.sqrt(run_var + eps)
    bn_bias = beta - run_mean * bn_scale

    fc_w = jax.random.normal(ks[5], (C, D), jnp.float32) * 0.1
    fc_b = 0.05 * jax.random.normal(ks[6], (D,), jnp.float32)
    fcs_w = jax.random.normal(ks[7], (M, D, C), jnp.float32) * 0.1
    fcs_b = 0.05 * jax.random.normal(ks[8], (M, C), jnp.float32)

    # --- offline parameter preparation (outside the jitted forward) ---------
    # expand grouped conv weights to dense masked (C_out, 9*C_in) matrices,
    # with the per-branch K index ordered as tap*C + cin (tap-major).
    group_id = jnp.arange(C) // CPG
    mask = (group_id[:, None] == group_id[None, :]).astype(jnp.float32)  # (Cout, Cin)
    ci_local = jnp.arange(C) % CPG
    dense = conv_w[:, :, ci_local, :, :] * mask[None, :, :, None, None]  # (M,Cout,Cin,3,3)
    w_mat = jnp.transpose(dense, (0, 1, 3, 4, 2)).reshape(M, C, K9C)     # (M,Cout,9*Cin)

    # fold eval-mode BN scale into the conv taps, then build the block-diagonal
    # fused weight matrix (2C, 2*9C): rows 0:C use branch 0, rows C:2C branch 1.
    w_scaled = w_mat * bn_scale[:, :, None]                              # (M, C, 9C)
    zblk = jnp.zeros((C, K9C), jnp.float32)
    w_bd = jnp.concatenate(
        [jnp.concatenate([w_scaled[0], zblk], axis=1),
         jnp.concatenate([zblk, w_scaled[1]], axis=1)], axis=0)          # (2C, 2*9C)
    bn_bias_col = bn_bias.reshape(MC, 1)                                 # (2C, 1)

    # fuse fc -> fcs (no nonlinearity between them in this module):
    #   logits[m] = fcs_w[m]^T @ (fc_w^T @ fea_s + fc_b) + fcs_b[m]
    w_comb = jnp.concatenate(
        [fcs_w[m].T @ fc_w.T for m in range(M)], axis=0)                 # (2C, C)
    b_comb = jnp.concatenate(
        [(fcs_w[m].T @ fc_b + fcs_b[m]).reshape(C, 1) for m in range(M)],
        axis=0)                                                          # (2C, 1)

    x = jax.random.normal(jax.random.PRNGKey(42), (N, C, H, W), jnp.float32)

    out = skconv_forward(x, w_bd, bn_bias_col, w_comb, b_comb)
    out = jax.block_until_ready(out)

    ref = reference(x, conv_w, bn_scale, bn_bias, fc_w, fc_b, fcs_w, fcs_b)
    assert out.shape == (N, C, H, W)
    assert jnp.allclose(out, ref, rtol=1e-4, atol=1e-4), \
        float(jnp.max(jnp.abs(out - ref)))

    print("KERNEL_OK")
</pallas_src>

<mosaic_0001>
module attributes {stable_mosaic.version = 11 : i64} {
  func.func @skconv_kernel(%arg0: i32, %arg1: memref<1x1152x256xf32, #tpu.memory_space<vmem>>, %arg2: memref<128x1152xf32, #tpu.memory_space<vmem>>, %arg3: memref<128x1xf32, #tpu.memory_space<vmem>>, %arg4: memref<128x64xf32, #tpu.memory_space<vmem>>, %arg5: memref<128x1xf32, #tpu.memory_space<vmem>>, %arg6: memref<1x64x256xf32, #tpu.memory_space<vmem>>, %arg7: memref<128x256xf32, #tpu.memory_space<vmem>>) attributes {dimension_semantics = [#tpu.dimension_semantics<parallel>], iteration_bounds = array<i64: 2>, scalar_prefetch = 0 : i64, scratch_operands = 1 : i64, tpu.core_type = #tpu.core_type<tc>, window_params = [{transform_indices = @transform_0, window_bounds = array<i64: 1, 1152, 256>}, {pipeline_mode = #tpu.pipeline_mode<synchronous>, transform_indices = @transform_1, window_bounds = array<i64: 128, 1152>}, {pipeline_mode = #tpu.pipeline_mode<synchronous>, transform_indices = @transform_2, window_bounds = array<i64: 128, 1>}, {pipeline_mode = #tpu.pipeline_mode<synchronous>, transform_indices = @transform_3, window_bounds = array<i64: 128, 64>}, {pipeline_mode = #tpu.pipeline_mode<synchronous>, transform_indices = @transform_4, window_bounds = array<i64: 128, 1>}, {transform_indices = @transform_5, window_bounds = array<i64: 1, 64, 256>}]} {
    %c0 = arith.constant 0 : index
    %c0_0 = arith.constant 0 : index
    %0 = vector.load %arg2[%c0, %c0_0] : memref<128x1152xf32, #tpu.memory_space<vmem>>, vector<128x1152xf32>
    %c0_1 = arith.constant 0 : index
    %c0_2 = arith.constant 0 : index
    %c0_3 = arith.constant 0 : index
    %1 = vector.load %arg1[%c0_1, %c0_2, %c0_3] : memref<1x1152x256xf32, #tpu.memory_space<vmem>>, vector<1x1152x256xf32>
    %2 = vector.shape_cast %1 : vector<1x1152x256xf32> to vector<1152x256xf32>
    %cst = arith.constant dense<0.000000e+00> : vector<128x256xf32>
    %3 = tpu.matmul %0, %2, %cst {dimension_numbers = #tpu.dot_dimension_numbers<[1], [0], [0], [1], [0, 0, 1, 1], [], []>} : vector<128x1152xf32>, vector<1152x256xf32>, vector<128x256xf32> -> vector<128x256xf32>
    %c0_4 = arith.constant 0 : index
    %c0_5 = arith.constant 0 : index
    %4 = vector.load %arg3[%c0_4, %c0_5] : memref<128x1xf32, #tpu.memory_space<vmem>>, vector<128x1xf32>
    %5 = vector.broadcast %4 : vector<128x1xf32> to vector<128x256xf32>
    %6 = arith.addf %3, %5 : vector<128x256xf32>
    %cst_6 = arith.constant 0.000000e+00 : f32
    %7 = vector.broadcast %cst_6 : f32 to vector<128x256xf32>
    %8 = arith.maximumf %6, %7 : vector<128x256xf32>
    %c0_7 = arith.constant 0 : index
    %c0_8 = arith.constant 0 : index
    %9 = vector.load %arg7[%c0_7, %c0_8] : memref<128x256xf32, #tpu.memory_space<vmem>>, vector<128x256xf32>
    tpu.vector_store %arg7[%c0_7, %c0_8], %8 {strides = array<i32>} : memref<128x256xf32, #tpu.memory_space<vmem>>, vector<128x256xf32>,
    %cst_9 = arith.constant dense<0.000000e+00> : vector<128xf32>
    %10 = vector.multi_reduction <add>, %8, %cst_9 [1] : vector<128x256xf32> to vector<128xf32>
    %11 = vector.shape_cast %10 : vector<128xf32> to vector<128x1xf32>
    %12 = vector.extract_strided_slice %11 {offsets = [0, 0], sizes = [64, 1], strides = [1, 1]} : vector<128x1xf32> to vector<64x1xf32>
    %13 = vector.extract_strided_slice %11 {offsets = [64, 0], sizes = [64, 1], strides = [1, 1]} : vector<128x1xf32> to vector<64x1xf32>
    %14 = arith.addf %12, %13 : vector<64x1xf32>
    %cst_10 = arith.constant 3.906250e-03 : f32
    %15 = vector.broadcast %cst_10 : f32 to vector<64x1xf32>
    %16 = arith.mulf %14, %15 : vector<64x1xf32>
    %c0_11 = arith.constant 0 : index
    %c0_12 = arith.constant 0 : index
    %17 = vector.load %arg4[%c0_11, %c0_12] : memref<128x64xf32, #tpu.memory_space<vmem>>, vector<128x64xf32>
    %cst_13 = arith.constant dense<0.000000e+00> : vector<128x1xf32>
    %18 = tpu.matmul %17, %16, %cst_13 {dimension_numbers = #tpu.dot_dimension_numbers<[1], [0], [0], [1], [0, 0, 1, 1], [], []>} : vector<128x64xf32>, vector<64x1xf32>, vector<128x1xf32> -> vector<128x1xf32>
    %c0_14 = arith.constant 0 : index
    %c0_15 = arith.constant 0 : index
    %19 = vector.load %arg5[%c0_14, %c0_15] : memref<128x1xf32, #tpu.memory_space<vmem>>, vector<128x1xf32>
    %20 = arith.addf %18, %19 : vector<128x1xf32>
    %21 = vector.extract_strided_slice %20 {offsets = [0, 0], sizes = [64, 1], strides = [1, 1]} : vector<128x1xf32> to vector<64x1xf32>
    %22 = vector.extract_strided_slice %20 {offsets = [64, 0], sizes = [64, 1], strides = [1, 1]} : vector<128x1xf32> to vector<64x1xf32>
    %23 = arith.subf %21, %22 : vector<64x1xf32>
    %24 = math.exp %23 : vector<64x1xf32>
    %cst_16 = arith.constant 1.000000e+00 : f32
    %25 = vector.broadcast %cst_16 : f32 to vector<64x1xf32>
    %26 = arith.addf %25, %24 : vector<64x1xf32>
    %cst_17 = arith.constant 1.000000e+00 : f32
    %27 = vector.broadcast %cst_17 : f32 to vector<64x1xf32>
    %28 = arith.divf %27, %26 : vector<64x1xf32>
    %cst_18 = arith.constant 1.000000e+00 : f32
    %29 = vector.broadcast %cst_18 : f32 to vector<64x1xf32>
    %30 = arith.subf %29, %28 : vector<64x1xf32>
    %c0_19 = arith.constant 0 : index
    %c0_20 = arith.constant 0 : index
    %31 = vector.load %arg7[%c0_19, %c0_20] : memref<128x256xf32, #tpu.memory_space<vmem>>, vector<64x256xf32>
    %32 = vector.broadcast %30 : vector<64x1xf32> to vector<64x256xf32>
    %33 = arith.mulf %32, %31 : vector<64x256xf32>
    %c64 = arith.constant 64 : index
    %c0_21 = arith.constant 0 : index
    %34 = vector.load %arg7[%c64, %c0_21] : memref<128x256xf32, #tpu.memory_space<vmem>>, vector<64x256xf32>
    %35 = vector.broadcast %28 : vector<64x1xf32> to vector<64x256xf32>
    %36 = arith.mulf %35, %34 : vector<64x256xf32>
    %37 = arith.addf %33, %36 : vector<64x256xf32>
    %c0_22 = arith.constant 0 : index
    %c0_23 = arith.constant 0 : index
    %c0_24 = arith.constant 0 : index
    %38 = vector.load %arg6[%c0_22, %c0_23, %c0_24] : memref<1x64x256xf32, #tpu.memory_space<vmem>>, vector<1x64x256xf32>
    %39 = vector.shape_cast %38 : vector<1x64x256xf32> to vector<64x256xf32>
    %40 = vector.shape_cast %37 : vector<64x256xf32> to vector<1x64x256xf32>
    tpu.vector_store %arg6[%c0_22, %c0_23, %c0_24], %40 {strides = array<i32>} : memref<1x64x256xf32, #tpu.memory_space<vmem>>, vector<1x64x256xf32>,
    return
  }
  func.func @transform_0(%arg0: i32) -> (i32, i32, i32) {
    %c0_i32 = arith.constant 0 : i32
    %c0_i32_0 = arith.constant 0 : i32
    %c0_i32_1 = arith.constant 0 : i32
    return %arg0, %c0_i32, %c0_i32_0 : i32, i32, i32
  }
  func.func @transform_1(%arg0: i32) -> (i32, i32) {
    %c0_i32 = arith.constant 0 : i32
    %c0_i32_0 = arith.constant 0 : i32
    %c0_i32_1 = arith.constant 0 : i32
    return %c0_i32, %c0_i32_0 : i32, i32
  }
  func.func @transform_2(%arg0: i32) -> (i32, i32) {
    %c0_i32 = arith.constant 0 : i32
    %c0_i32_0 = arith.constant 0 : i32
    %c0_i32_1 = arith.constant 0 : i32
    return %c0_i32, %c0_i32_0 : i32, i32
  }
  func.func @transform_3(%arg0: i32) -> (i32, i32) {
    %c0_i32 = arith.constant 0 : i32
    %c0_i32_0 = arith.constant 0 : i32
    %c0_i32_1 = arith.constant 0 : i32
    return %c0_i32, %c0_i32_0 : i32, i32
  }
  func.func @transform_4(%arg0: i32) -> (i32, i32) {
    %c0_i32 = arith.constant 0 : i32
    %c0_i32_0 = arith.constant 0 : i32
    %c0_i32_1 = arith.constant 0 : i32
    return %c0_i32, %c0_i32_0 : i32, i32
  }
  func.func @transform_5(%arg0: i32) -> (i32, i32, i32) {
    %c0_i32 = arith.constant 0 : i32
    %c0_i32_0 = arith.constant 0 : i32
    %c0_i32_1 = arith.constant 0 : i32
    return %arg0, %c0_i32, %c0_i32_0 : i32, i32, i32
  }
}

</mosaic_0001>

<bundles_post_ra>
// kernel: skconv_forward.1
= control target key start
LH: loop header
LB: loop body
LE: loop exit
PB: predicated region body
PF: predicated region fallthrough
CT: control target
= control target key end

     0   :  { %s2407_s18 = smov 0   ;;  %s3829_s0 = inlined_call_operand.vmem [shape: f32[2,1152,256], index: 0, kind: input, shape index: {}]   ;;  %s3830_s1 = inlined_call_operand.vmem [shape: f32[128,1152], index: 1, kind: input, shape index: {}]   ;;  %s3831_s2 = inlined_call_operand.vmem [shape: f32[128,1], index: 2, kind: input, shape index: {}]   ;;  %s3832_s3 = inlined_call_operand.vmem [shape: f32[128,64], index: 3, kind: input, shape index: {}]   ;;  %s3833_s4 = inlined_call_operand.vmem [shape: f32[128,1], index: 4, kind: input, shape index: {}]   ;;  %s3834_s5 = inlined_call_operand.vmem [shape: f32[2,64,256], index: 5, kind: output, shape index: {}]  }
   0x1 LB: > { %s2199_s19 = sadd.s32 4294967295, %s2373_s18   ;;  %p2203_p0 = scmp.ge.s32.totalorder %s2373_s18, 1  ;;  %s2373_s18 = sphi %s2407_s18, %s15_s18  }
   0x2   : > { %p187_p1 = scmp.lt.s32.totalorder %s2373_s18, 3 }
   0x4   : > { %p188_p2 = pnand %p2203_p0, %p187_p1 }
   0x6   : > { %191 = sbr.rel (%p188_p2) target bundleno = 1053 (0x41d), region = 40 }
   0xb   : > { %p215_p3 = scmp.lt.s32.totalorder %s2199_s19, 1  ;;  %v226_v0 = vld [vmem:[%s3830_s1 + $0x8] sm:$0xff]  ;;  %v228_v1 = vld [vmem:[%s3830_s1 + $0x18] sm:$0xff]  ;;  %v2375_v2 = vmov 0   ;;  %vm1718_vm0 = vcmask 523264  }
   0xc   : > { %817 = vmatprep.mubr.f32.mxu0 %v226_v0  ;;  %978 = vmatprep.mubr.f32.mxu1 %v228_v1 }
   0xd   : > { %s3898_s19 = smov (!%p215_p3, %s2199_s19), 1  ;;  %2333 = vset.pattern.permute.xlu0 %v2375_v2  ;;  %2334 = vset.pattern.permute.xlu1 %v2375_v2 }
   0xe   : > { %s2322_s24 = smul.u32 2304, %s3898_s19 }
  0x10   : > { %s2427_s27 = scalar_lea.vmem %s3829_s0, %s2322_s24 }
  0x11   : > { %v400_v3 = vld [vmem:[%s2427_s27 + $0xf8] sm:$0xff]  ;;  %v399_v5 = vld [vmem:[%s2427_s27 + $0xf0] sm:$0xff]  ;;  %v398_v7 = vld [vmem:[%s2427_s27 + $0xe8] sm:$0xff] }
  0x12   : > { %v464_v4 = vld [vmem:[%s2427_s27 + $0x2f8] sm:$0xff]  ;;  %753 = vmatprep.subr.mxu0 %v400_v3  ;;  %v463_v6 = vld [vmem:[%s2427_s27 + $0x2f0] sm:$0xff]  ;;  %v462_v8 = vld [vmem:[%s2427_s27 + $0x2e8] sm:$0xff] }
  0x13   : > { %914 = vmatprep.subr.mxu1 %v464_v4  ;;  %754 = vmatpush1.msra.mxu0 %v399_v5  ;;  %v397_v9 = vld [vmem:[%s2427_s27 + $0xe0] sm:$0xff]  ;;  %v396_v11 = vld [vmem:[%s2427_s27 + $0xd8] sm:$0xff]  ;;  %v395_v13 = vld [vmem:[%s2427_s27 + $0xd0] sm:$0xff] }
  0x14   : > { %915 = vmatpush1.msra.mxu1 %v463_v6  ;;  %v461_v10 = vld [vmem:[%s2427_s27 + $0x2e0] sm:$0xff]  ;;  %755 = vmatprep.subr.mxu0 %v398_v7  ;;  %v460_v12 = vld [vmem:[%s2427_s27 + $0x2d8] sm:$0xff]  ;;  %v459_v14 = vld [vmem:[%s2427_s27 + $0x2d0] sm:$0xff] }
  0x15   : > { %916 = vmatprep.subr.mxu1 %v462_v8  ;;  %756 = vmatpush1.msra.mxu0 %v397_v9  ;;  %v394_v15 = vld [vmem:[%s2427_s27 + $0xc8] sm:$0xff]  ;;  %v393_v17 = vld [vmem:[%s2427_s27 + $0xc0] sm:$0xff]  ;;  %v392_v19 = vld [vmem:[%s2427_s27 + $0xb8] sm:$0xff] }
  0x16   : > { %917 = vmatpush1.msra.mxu1 %v461_v10  ;;  %v458_v16 = vld [vmem:[%s2427_s27 + $0x2c8] sm:$0xff]  ;;  %757 = vmatprep.subr.mxu0 %v396_v11  ;;  %v457_v18 = vld [vmem:[%s2427_s27 + $0x2c0] sm:$0xff]  ;;  %v456_v20 = vld [vmem:[%s2427_s27 + $0x2b8] sm:$0xff] }
  0x17   : > { %918 = vmatprep.subr.mxu1 %v460_v12  ;;  %758 = vmatpush1.msra.mxu0 %v395_v13  ;;  %v391_v21 = vld [vmem:[%s2427_s27 + $0xb0] sm:$0xff]  ;;  %v390_v23 = vld [vmem:[%s2427_s27 + $0xa8] sm:$0xff]  ;;  %v389_v25 = vld [vmem:[%s2427_s27 + $0xa0] sm:$0xff] }
  0x18   : > { %919 = vmatpush1.msra.mxu1 %v459_v14  ;;  %759 = vmatprep.subr.mxu0 %v394_v15  ;;  %v455_v22 = vld [vmem:[%s2427_s27 + $0x2b0] sm:$0xff]  ;;  %v454_v24 = vld [vmem:[%s2427_s27 + $0x2a8] sm:$0xff]  ;;  %v453_v26 = vld [vmem:[%s2427_s27 + $0x2a0] sm:$0xff] }
  0x19   : > { %920 = vmatprep.subr.mxu1 %v458_v16  ;;  %760 = vmatpush1.msra.mxu0 %v393_v17  ;;  %v388_v27 = vld [vmem:[%s2427_s27 + $0x98] sm:$0xff]  ;;  %v387_v29 = vld [vmem:[%s2427_s27 + $0x90] sm:$0xff]  ;;  %v386_v31 = vld [vmem:[%s2427_s27 + $0x88] sm:$0xff] }
  0x1a   : > { %921 = vmatpush1.msra.mxu1 %v457_v18  ;;  %761 = vmatprep.subr.mxu0 %v392_v19  ;;  %v452_v28 = vld [vmem:[%s2427_s27 + $0x298] sm:$0xff]  ;;  %v451_v30 = vld [vmem:[%s2427_s27 + $0x290] sm:$0xff]  ;;  %v450_v32 = vld [vmem:[%s2427_s27 + $0x288] sm:$0xff] }
  0x1b   : > { %922 = vmatprep.subr.mxu1 %v456_v20  ;;  %762 = vmatpush1.msra.mxu0 %v391_v21  ;;  %v385_v33 = vld [vmem:[%s2427_s27 + $0x80] sm:$0xff]  ;;  %v384_v35 = vld [vmem:[%s2427_s27 + $0x78] sm:$0xff]  ;;  %v383_v37 = vld [vmem:[%s2427_s27 + $0x70] sm:$0xff] }
  0x1c   : > { %923 = vmatpush1.msra.mxu1 %v455_v22  ;;  %763 = vmatprep.subr.mxu0 %v390_v23  ;;  %v449_v34 = vld [vmem:[%s2427_s27 + $0x280] sm:$0xff]  ;;  %v448_v36 = vld [vmem:[%s2427_s27 + $0x278] sm:$0xff]  ;;  %v447_v38 = vld [vmem:[%s2427_s27 + $0x270] sm:$0xff] }
  0x1d   : > { %924 = vmatprep.subr.mxu1 %v454_v24  ;;  %764 = vmatpush1.msra.mxu0 %v389_v25  ;;  %v382_v39 = vld [vmem:[%s2427_s27 + $0x68] sm:$0xff]  ;;  %v381_v41 = vld [vmem:[%s2427_s27 + $0x60] sm:$0xff]  ;;  %v380_v43 = vld [vmem:[%s2427_s27 + $0x58] sm:$0xff] }
  0x1e   : > { %925 = vmatpush1.msra.mxu1 %v453_v26  ;;  %765 = vmatprep.subr.mxu0 %v388_v27  ;;  %v446_v40 = vld [vmem:[%s2427_s27 + $0x268] sm:$0xff]  ;;  %v445_v42 = vld [vmem:[%s2427_s27 + $0x260] sm:$0xff]  ;;  %v444_v44 = vld [vmem:[%s2427_s27 + $0x258] sm:$0xff] }
  0x1f   : > { %926 = vmatprep.subr.mxu1 %v452_v28  ;;  %766 = vmatpush1.msra.mxu0 %v387_v29  ;;  %v379_v45 = vld [vmem:[%s2427_s27 + $0x50] sm:$0xff]  ;;  %v378_v47 = vld [vmem:[%s2427_s27 + $0x48] sm:$0xff]  ;;  %v377_v49 = vld [vmem:[%s2427_s27 + $0x40] sm:$0xff] }
  0x20   : > { %927 = vmatpush1.msra.mxu1 %v451_v30  ;;  %767 = vmatprep.subr.mxu0 %v386_v31  ;;  %v443_v46 = vld [vmem:[%s2427_s27 + $0x250] sm:$0xff]  ;;  %v442_v48 = vld [vmem:[%s2427_s27 + $0x248] sm:$0xff]  ;;  %v441_v50 = vld [vmem:[%s2427_s27 + $0x240] sm:$0xff] }
  0x21   : > { %928 = vmatprep.subr.mxu1 %v450_v32  ;;  %768 = vmatpush1.msra.mxu0 %v385_v33  ;;  %v376_v51 = vld [vmem:[%s2427_s27 + $0x38] sm:$0xff]  ;;  %v375_v53 = vld [vmem:[%s2427_s27 + $0x30] sm:$0xff]  ;;  %v374_v55 = vld [vmem:[%s2427_s27 + $0x28] sm:$0xff] }
  0x22   : > { %929 = vmatpush1.msra.mxu1 %v449_v34  ;;  %769 = vmatprep.subr.mxu0 %v384_v35  ;;  %v440_v52 = vld [vmem:[%s2427_s27 + $0x238] sm:$0xff]  ;;  %v439_v54 = vld [vmem:[%s2427_s27 + $0x230] sm:$0xff]  ;;  %v438_v56 = vld [vmem:[%s2427_s27 + $0x228] sm:$0xff] }
  0x23   : > { %930 = vmatprep.subr.mxu1 %v448_v36  ;;  %770 = vmatpush1.msra.mxu0 %v383_v37  ;;  %v373_v57 = vld [vmem:[%s2427_s27 + $0x20] sm:$0xff]  ;;  %v372_v59 = vld [vmem:[%s2427_s27 + $0x18] sm:$0xff]  ;;  %v371_v61 = vld [vmem:[%s2427_s27 + $0x10] sm:$0xff] }
  0x24   : > { %931 = vmatpush1.msra.mxu1 %v447_v38  ;;  %771 = vmatprep.subr.mxu0 %v382_v39  ;;  %v437_v58 = vld [vmem:[%s2427_s27 + $0x220] sm:$0xff]  ;;  %v436_v60 = vld [vmem:[%s2427_s27 + $0x218] sm:$0xff]  ;;  %v435_v62 = vld [vmem:[%s2427_s27 + $0x210] sm:$0xff] }
  0x25   : > { %932 = vmatprep.subr.mxu1 %v446_v40  ;;  %772 = vmatpush1.msra.mxu0 %v381_v41  ;;  %v370_v63 = vld [vmem:[%s2427_s27 + $0x8] sm:$0xff]  ;;  %v369_v1 = vld [vmem:[%s2427_s27] sm:$0xff]  ;;  %v432_v3 = vld [vmem:[%s2427_s27 + $0x1f8] sm:$0xff] }
  0x26   : > { %933 = vmatpush1.msra.mxu1 %v445_v42  ;;  %773 = vmatprep.subr.mxu0 %v380_v43  ;;  %v434_v0 = vld [vmem:[%s2427_s27 + $0x208] sm:$0xff]  ;;  %v433_v2 = vld [vmem:[%s2427_s27 + $0x200] sm:$0xff]  ;;  %v496_v4 = vld [vmem:[%s2427_s27 + $0x3f8] sm:$0xff] }
  0x27   : > { %934 = vmatprep.subr.mxu1 %v444_v44  ;;  %774 = vmatpush1.msra.mxu0 %v379_v45  ;;  %v431_v5 = vld [vmem:[%s2427_s27 + $0x1f0] sm:$0xff]  ;;  %v430_v7 = vld [vmem:[%s2427_s27 + $0x1e8] sm:$0xff]  ;;  %v429_v9 = vld [vmem:[%s2427_s27 + $0x1e0] sm:$0xff] }
  0x28   : > { %935 = vmatpush1.msra.mxu1 %v443_v46  ;;  %775 = vmatprep.subr.mxu0 %v378_v47  ;;  %v495_v6 = vld [vmem:[%s2427_s27 + $0x3f0] sm:$0xff]  ;;  %v494_v8 = vld [vmem:[%s2427_s27 + $0x3e8] sm:$0xff]  ;;  %v493_v10 = vld [vmem:[%s2427_s27 + $0x3e0] sm:$0xff] }
  0x29   : > { %936 = vmatprep.subr.mxu1 %v442_v48  ;;  %776 = vmatpush1.msra.mxu0 %v377_v49  ;;  %v428_v11 = vld [vmem:[%s2427_s27 + $0x1d8] sm:$0xff]  ;;  %v427_v13 = vld [vmem:[%s2427_s27 + $0x1d0] sm:$0xff]  ;;  %v426_v15 = vld [vmem:[%s2427_s27 + $0x1c8] sm:$0xff] }
  0x2a   : > { %937 = vmatpush1.msra.mxu1 %v441_v50  ;;  %777 = vmatprep.subr.mxu0 %v376_v51  ;;  %v492_v12 = vld [vmem:[%s2427_s27 + $0x3d8] sm:$0xff]  ;;  %v491_v14 = vld [vmem:[%s2427_s27 + $0x3d0] sm:$0xff]  ;;  %v490_v16 = vld [vmem:[%s2427_s27 + $0x3c8] sm:$0xff] }
  0x2b   : > { %938 = vmatprep.subr.mxu1 %v440_v52  ;;  %778 = vmatpush1.msra.mxu0 %v375_v53  ;;  %v425_v17 = vld [vmem:[%s2427_s27 + $0x1c0] sm:$0xff]  ;;  %v424_v19 = vld [vmem:[%s2427_s27 + $0x1b8] sm:$0xff]  ;;  %v423_v21 = vld [vmem:[%s2427_s27 + $0x1b0] sm:$0xff] }
  0x2c   : > { %939 = vmatpush1.msra.mxu1 %v439_v54  ;;  %779 = vmatprep.subr.mxu0 %v374_v55  ;;  %v489_v18 = vld [vmem:[%s2427_s27 + $0x3c0] sm:$0xff]  ;;  %v488_v20 = vld [vmem:[%s2427_s27 + $0x3b8] sm:$0xff]  ;;  %v487_v22 = vld [vmem:[%s2427_s27 + $0x3b0] sm:$0xff] }
  0x2d   : > { %940 = vmatprep.subr.mxu1 %v438_v56  ;;  %780 = vmatpush1.msra.mxu0 %v373_v57  ;;  %v422_v23 = vld [vmem:[%s2427_s27 + $0x1a8] sm:$0xff]  ;;  %v421_v25 = vld [vmem:[%s2427_s27 + $0x1a0] sm:$0xff]  ;;  %v420_v27 = vld [vmem:[%s2427_s27 + $0x198] sm:$0xff] }
  0x2e   : > { %941 = vmatpush1.msra.mxu1 %v437_v58  ;;  %781 = vmatprep.subr.mxu0 %v372_v59  ;;  %v486_v24 = vld [vmem:[%s2427_s27 + $0x3a8] sm:$0xff]  ;;  %v485_v26 = vld [vmem:[%s2427_s27 + $0x3a0] sm:$0xff]  ;;  %v484_v28 = vld [vmem:[%s2427_s27 + $0x398] sm:$0xff] }
  0x2f   : > { %942 = vmatprep.subr.mxu1 %v436_v60  ;;  %782 = vmatpush1.msra.mxu0 %v371_v61  ;;  %v419_v29 = vld [vmem:[%s2427_s27 + $0x190] sm:$0xff]  ;;  %v418_v31 = vld [vmem:[%s2427_s27 + $0x188] sm:$0xff]  ;;  %v417_v33 = vld [vmem:[%s2427_s27 + $0x180] sm:$0xff] }
  0x30   : > { %943 = vmatpush1.msra.mxu1 %v435_v62  ;;  %783 = vmatprep.subr.mxu0 %v370_v63  ;;  %v483_v30 = vld [vmem:[%s2427_s27 + $0x390] sm:$0xff]  ;;  %v482_v32 = vld [vmem:[%s2427_s27 + $0x388] sm:$0xff]  ;;  %v481_v34 = vld [vmem:[%s2427_s27 + $0x380] sm:$0xff] }
  0x31   : > { %944 = vmatprep.subr.mxu1 %v434_v0  ;;  %784 = vmatpush1.msra.mxu0 %v369_v1  ;;  %v416_v35 = vld [vmem:[%s2427_s27 + $0x178] sm:$0xff]  ;;  %v415_v37 = vld [vmem:[%s2427_s27 + $0x170] sm:$0xff]  ;;  %v414_v39 = vld [vmem:[%s2427_s27 + $0x168] sm:$0xff] }
  0x32   : > { %945 = vmatpush1.msra.mxu1 %v433_v2  ;;  %785 = vmatprep.subr.mxu0 %v432_v3  ;;  %v480_v36 = vld [vmem:[%s2427_s27 + $0x378] sm:$0xff]  ;;  %v479_v38 = vld [vmem:[%s2427_s27 + $0x370] sm:$0xff]  ;;  %v478_v40 = vld [vmem:[%s2427_s27 + $0x368] sm:$0xff] }
  0x33   : > { %946 = vmatprep.subr.mxu1 %v496_v4  ;;  %786 = vmatpush2.msra.mxu0 %v431_v5  ;;  %v413_v41 = vld [vmem:[%s2427_s27 + $0x160] sm:$0xff]  ;;  %v412_v43 = vld [vmem:[%s2427_s27 + $0x158] sm:$0xff]  ;;  %v411_v45 = vld [vmem:[%s2427_s27 + $0x150] sm:$0xff] }
  0x34   : > { %947 = vmatpush2.msra.mxu1 %v495_v6  ;;  %787 = vmatprep.subr.mxu0 %v430_v7  ;;  %v477_v42 = vld [vmem:[%s2427_s27 + $0x360] sm:$0xff]  ;;  %v476_v44 = vld [vmem:[%s2427_s27 + $0x358] sm:$0xff]  ;;  %v475_v46 = vld [vmem:[%s2427_s27 + $0x350] sm:$0xff] }
  0x35   : > { %948 = vmatprep.subr.mxu1 %v494_v8  ;;  %788 = vmatpush2.msra.mxu0 %v429_v9  ;;  %v410_v47 = vld [vmem:[%s2427_s27 + $0x148] sm:$0xff]  ;;  %v409_v49 = vld [vmem:[%s2427_s27 + $0x140] sm:$0xff]  ;;  %v408_v51 = vld [vmem:[%s2427_s27 + $0x138] sm:$0xff] }
  0x36   : > { %949 = vmatpush2.msra.mxu1 %v493_v10  ;;  %789 = vmatprep.subr.mxu0 %v428_v11  ;;  %v474_v48 = vld [vmem:[%s2427_s27 + $0x348] sm:$0xff]  ;;  %v473_v50 = vld [vmem:[%s2427_s27 + $0x340] sm:$0xff]  ;;  %v472_v52 = vld [vmem:[%s2427_s27 + $0x338] sm:$0xff] }
  0x37   : > { %950 = vmatprep.subr.mxu1 %v492_v12  ;;  %790 = vmatpush2.msra.mxu0 %v427_v13  ;;  %v407_v53 = vld [vmem:[%s2427_s27 + $0x130] sm:$0xff]  ;;  %v406_v55 = vld [vmem:[%s2427_s27 + $0x128] sm:$0xff]  ;;  %v405_v57 = vld [vmem:[%s2427_s27 + $0x120] sm:$0xff] }
  0x38   : > { %951 = vmatpush2.msra.mxu1 %v491_v14  ;;  %791 = vmatprep.subr.mxu0 %v426_v15  ;;  %v471_v54 = vld [vmem:[%s2427_s27 + $0x330] sm:$0xff]  ;;  %v470_v56 = vld [vmem:[%s2427_s27 + $0x328] sm:$0xff]  ;;  %v469_v58 = vld [vmem:[%s2427_s27 + $0x320] sm:$0xff] }
  0x39   : > { %952 = vmatprep.subr.mxu1 %v490_v16  ;;  %792 = vmatpush2.msra.mxu0 %v425_v17  ;;  %v404_v59 = vld [vmem:[%s2427_s27 + $0x118] sm:$0xff]  ;;  %v403_v61 = vld [vmem:[%s2427_s27 + $0x110] sm:$0xff]  ;;  %v402_v63 = vld [vmem:[%s2427_s27 + $0x108] sm:$0xff] }
  0x3a   : > { %953 = vmatpush2.msra.mxu1 %v489_v18  ;;  %793 = vmatprep.subr.mxu0 %v424_v19  ;;  %v468_v60 = vld [vmem:[%s2427_s27 + $0x318] sm:$0xff]  ;;  %v467_v62 = vld [vmem:[%s2427_s27 + $0x310] sm:$0xff]  ;;  %v466_v0 = vld [vmem:[%s2427_s27 + $0x308] sm:$0xff] }
  0x3b   : > { %954 = vmatprep.subr.mxu1 %v488_v20  ;;  %794 = vmatpush2.msra.mxu0 %v423_v21  ;;  %v401_v1 = vld [vmem:[%s2427_s27 + $0x100] sm:$0xff]  ;;  %v227_v4 = vld [vmem:[%s3830_s1 + $0x10] sm:$0xff]  ;;  %v528_v5 = vld [vmem:[%s2427_s27 + $0x4f8] sm:$0xff] }
  0x3c   : > { %955 = vmatpush2.msra.mxu1 %v487_v22  ;;  %795 = vmatprep.subr.mxu0 %v422_v23  ;;  %v465_v2 = vld [vmem:[%s2427_s27 + $0x300] sm:$0xff]  ;;  %v592_v6 = vld [vmem:[%s2427_s27 + $0x6f8] sm:$0xff]  ;;  %v527_v7 = vld [vmem:[%s2427_s27 + $0x4f0] sm:$0xff] }
  0x3d   : > { %956 = vmatprep.subr.mxu1 %v486_v24  ;;  %796 = vmatpush2.msra.mxu0 %v421_v25  ;;  %v225_v3 = vld [vmem:[%s3830_s1] sm:$0xff]  ;;  %v591_v8 = vld [vmem:[%s2427_s27 + $0x6f0] sm:$0xff]  ;;  %v526_v9 = vld [vmem:[%s2427_s27 + $0x4e8] sm:$0xff] }
  0x3e   : > { %957 = vmatpush2.msra.mxu1 %v485_v26  ;;  %797 = vmatprep.subr.mxu0 %v420_v27  ;;  %v590_v10 = vld [vmem:[%s2427_s27 + $0x6e8] sm:$0xff]  ;;  %v235_v11 = vld [vmem:[%s3830_s1 + $0x50] sm:$0xff]  ;;  %v237_v12 = vld [vmem:[%s3830_s1 + $0x60] sm:$0xff] }
  0x3f   : > { %958 = vmatprep.subr.mxu1 %v484_v28  ;;  %798 = vmatpush2.msra.mxu0 %v419_v29  ;;  %v525_v13 = vld [vmem:[%s2427_s27 + $0x4e0] sm:$0xff]  ;;  %v234_v15 = vld [vmem:[%s3830_s1 + $0x48] sm:$0xff]  ;;  %v236_v16 = vld [vmem:[%s3830_s1 + $0x58] sm:$0xff] }
  0x40   : > { %959 = vmatpush2.msra.mxu1 %v483_v30  ;;  %799 = vmatprep.subr.mxu0 %v418_v31  ;;  %v589_v14 = vld [vmem:[%s2427_s27 + $0x6e0] sm:$0xff]  ;;  %v524_v17 = vld [vmem:[%s2427_s27 + $0x4d8] sm:$0xff]  ;;  %v523_v19 = vld [vmem:[%s2427_s27 + $0x4d0] sm:$0xff] }
  0x41   : > { %960 = vmatprep.subr.mxu1 %v482_v32  ;;  %800 = vmatpush2.msra.mxu0 %v417_v33  ;;  %v588_v18 = vld [vmem:[%s2427_s27 + $0x6d8] sm:$0xff]  ;;  %v587_v20 = vld [vmem:[%s2427_s27 + $0x6d0] sm:$0xff]  ;;  %v522_v21 = vld [vmem:[%s2427_s27 + $0x4c8] sm:$0xff] }
  0x42   : > { %961 = vmatpush2.msra.mxu1 %v481_v34  ;;  %801 = vmatprep.subr.mxu0 %v416_v35  ;;  %v586_v22 = vld [vmem:[%s2427_s27 + $0x6c8] sm:$0xff]  ;;  %v244_v23 = vld [vmem:[%s3830_s1 + $0x98] sm:$0xff]  ;;  %v521_v25 = vld [vmem:[%s2427_s27 + $0x4c0] sm:$0xff] }
  0x43   : > { %962 = vmatprep.subr.mxu1 %v480_v36  ;;  %802 = vmatpush2.msra.mxu0 %v415_v37  ;;  %v246_v24 = vld [vmem:[%s3830_s1 + $0xa8] sm:$0xff]  ;;  %v585_v26 = vld [vmem:[%s2427_s27 + $0x6c0] sm:$0xff]  ;;  %v243_v27 = vld [vmem:[%s3830_s1 + $0x90] sm:$0xff] }
  0x44   : > { %963 = vmatpush2.msra.mxu1 %v479_v38  ;;  %803 = vmatprep.subr.mxu0 %v414_v39  ;;  %v245_v28 = vld [vmem:[%s3830_s1 + $0xa0] sm:$0xff]  ;;  %v520_v29 = vld [vmem:[%s2427_s27 + $0x4b8] sm:$0xff]  ;;  %v519_v31 = vld [vmem:[%s2427_s27 + $0x4b0] sm:$0xff] }
  0x45   : > { %964 = vmatprep.subr.mxu1 %v478_v40  ;;  %804 = vmatpush2.msra.mxu0 %v413_v41  ;;  %v584_v30 = vld [vmem:[%s2427_s27 + $0x6b8] sm:$0xff]  ;;  %v583_v32 = vld [vmem:[%s2427_s27 + $0x6b0] sm:$0xff]  ;;  %v518_v33 = vld [vmem:[%s2427_s27 + $0x4a8] sm:$0xff] }
  0x46   : > { %965 = vmatpush2.msra.mxu1 %v477_v42  ;;  %805 = vmatprep.subr.mxu0 %v412_v43  ;;  %v582_v34 = vld [vmem:[%s2427_s27 + $0x6a8] sm:$0xff]  ;;  %v253_v35 = vld [vmem:[%s3830_s1 + $0xe0] sm:$0xff]  ;;  %v255_v36 = vld [vmem:[%s3830_s1 + $0xf0] sm:$0xff] }
  0x47   : > { %966 = vmatprep.subr.mxu1 %v476_v44  ;;  %806 = vmatpush2.msra.mxu0 %v411_v45  ;;  %v517_v37 = vld [vmem:[%s2427_s27 + $0x4a0] sm:$0xff]  ;;  %v252_v39 = vld [vmem:[%s3830_s1 + $0xd8] sm:$0xff]  ;;  %v254_v40 = vld [vmem:[%s3830_s1 + $0xe8] sm:$0xff] }
  0x48   : > { %967 = vmatpush2.msra.mxu1 %v475_v46  ;;  %807 = vmatprep.subr.mxu0 %v410_v47  ;;  %v581_v38 = vld [vmem:[%s2427_s27 + $0x6a0] sm:$0xff]  ;;  %v516_v41 = vld [vmem:[%s2427_s27 + $0x498] sm:$0xff]  ;;  %v515_v43 = vld [vmem:[%s2427_s27 + $0x490] sm:$0xff] }
  0x49   : > { %968 = vmatprep.subr.mxu1 %v474_v48  ;;  %808 = vmatpush2.msra.mxu0 %v409_v49  ;;  %v580_v42 = vld [vmem:[%s2427_s27 + $0x698] sm:$0xff]  ;;  %v579_v44 = vld [vmem:[%s2427_s27 + $0x690] sm:$0xff]  ;;  %v514_v45 = vld [vmem:[%s2427_s27 + $0x488] sm:$0xff] }
  0x4a   : > { %969 = vmatpush2.msra.mxu1 %v473_v50  ;;  %809 = vmatprep.subr.mxu0 %v408_v51  ;;  %v578_v46 = vld [vmem:[%s2427_s27 + $0x688] sm:$0xff]  ;;  %v264_v48 = vld [vmem:[%s3830_s1 + $0x138] sm:$0xff]  ;;  %v513_v49 = vld [vmem:[%s2427_s27 + $0x480] sm:$0xff] }
  0x4b   : > { %970 = vmatprep.subr.mxu1 %v472_v52  ;;  %810 = vmatpush2.msra.mxu0 %v407_v53  ;;  %v262_v47 = vld [vmem:[%s3830_s1 + $0x128] sm:$0xff]  ;;  %v577_v50 = vld [vmem:[%s2427_s27 + $0x680] sm:$0xff]  ;;  %v263_v52 = vld [vmem:[%s3830_s1 + $0x130] sm:$0xff] }
  0x4c   : > { %971 = vmatpush2.msra.mxu1 %v471_v54  ;;  %811 = vmatprep.subr.mxu0 %v406_v55  ;;  %v261_v51 = vld [vmem:[%s3830_s1 + $0x120] sm:$0xff]  ;;  %v512_v53 = vld [vmem:[%s2427_s27 + $0x478] sm:$0xff]  ;;  %v511_v55 = vld [vmem:[%s2427_s27 + $0x470] sm:$0xff] }
  0x4d   : > { %972 = vmatprep.subr.mxu1 %v470_v56  ;;  %812 = vmatpush2.msra.mxu0 %v405_v57  ;;  %v576_v54 = vld [vmem:[%s2427_s27 + $0x678] sm:$0xff]  ;;  %v575_v56 = vld [vmem:[%s2427_s27 + $0x670] sm:$0xff]  ;;  %v510_v57 = vld [vmem:[%s2427_s27 + $0x468] sm:$0xff] }
  0x4e   : > { %973 = vmatpush2.msra.mxu1 %v469_v58  ;;  %813 = vmatprep.subr.mxu0 %v404_v59  ;;  %v574_v58 = vld [vmem:[%s2427_s27 + $0x668] sm:$0xff]  ;;  %v271_v59 = vld [vmem:[%s3830_s1 + $0x170] sm:$0xff] }
  0x4f   : > { %974 = vmatprep.subr.mxu1 %v468_v60  ;;  %814 = vmatpush2.msra.mxu0 %v403_v61  ;;  %v273_v60 = vld [vmem:[%s3830_s1 + $0x180] sm:$0xff] }
  0x50   : > { %975 = vmatpush2.msra.mxu1 %v467_v62  ;;  %815 = vmatprep.subr.mxu0 %v402_v63  ;;  %v509_v61 = vld [vmem:[%s2427_s27 + $0x460] sm:$0xff]  ;;  %v270_v63 = vld [vmem:[%s3830_s1 + $0x168] sm:$0xff] }
  0x51   : > { %976 = vmatprep.subr.mxu1 %v466_v0  ;;  %816 = vmatpush2.msra.mxu0 %v401_v1  ;;  %v573_v62 = vld [vmem:[%s2427_s27 + $0x660] sm:$0xff]  ;;  %v272_v0 = vld [vmem:[%s3830_s1 + $0x178] sm:$0xff] }
  0x52   : > { %977 = vmatpush2.msra.mxu1 %v465_v2  ;;  %818 = vmatmul.mubr.f32.vlgmr.msra.gmra.mxu0 %v225_v3  ;;  %v508_v1 = vld [vmem:[%s2427_s27 + $0x458] sm:$0xff]  ;;  %v507_v3 = vld [vmem:[%s2427_s27 + $0x450] sm:$0xff] }
  0x53   : > { %979 = vmatmul.mubr.f32.vlgmr.msra.gmra.mxu1 %v227_v4  ;;  %1075 = vmatprep.subr.mxu0 %v528_v5  ;;  %v572_v2 = vld [vmem:[%s2427_s27 + $0x658] sm:$0xff]  ;;  %v571_v4 = vld [vmem:[%s2427_s27 + $0x650] sm:$0xff]  ;;  %v506_v5 = vld [vmem:[%s2427_s27 + $0x448] sm:$0xff] }
  0x54   : > { %1236 = vmatprep.subr.mxu1 %v592_v6  ;;  %1076 = vmatpush1.msra.mxu0 %v527_v7  ;;  %v570_v6 = vld [vmem:[%s2427_s27 + $0x648] sm:$0xff]  ;;  %v280_v7 = vld [vmem:[%s3830_s1 + $0x1b8] sm:$0xff] }
  0x55   : > { %1237 = vmatpush1.msra.mxu1 %v591_v8  ;;  %1077 = vmatprep.subr.mxu0 %v526_v9  ;;  %v282_v8 = vld [vmem:[%s3830_s1 + $0x1c8] sm:$0xff]  ;;  %v505_v9 = vld [vmem:[%s2427_s27 + $0x440] sm:$0xff] }
  0x56   : > { %1238 = vmatprep.subr.mxu1 %v590_v10  ;;  %823 = vmatprep.mubr.f32.mxu0 %v235_v11  ;;  %v569_v10 = vld [vmem:[%s2427_s27 + $0x640] sm:$0xff]  ;;  %v279_v11 = vld [vmem:[%s3830_s1 + $0x1b0] sm:$0xff] }
  0x57   : > { %984 = vmatprep.mubr.f32.mxu1 %v237_v12  ;;  %1078 = vmatpush1.msra.mxu0 %v525_v13  ;;  %v281_v12 = vld [vmem:[%s3830_s1 + $0x1c0] sm:$0xff]  ;;  %v504_v13 = vld [vmem:[%s2427_s27 + $0x438] sm:$0xff] }
  0x58   : > { %1239 = vmatpush1.msra.mxu1 %v589_v14  ;;  %824 = vmatmul.mubr.f32.gmra.mxu0 %v234_v15  ;;  %v568_v14 = vld [vmem:[%s2427_s27 + $0x638] sm:$0xff]  ;;  %v503_v15 = vld [vmem:[%s2427_s27 + $0x430] sm:$0xff] }
  0x59   : > { %985 = vmatmul.mubr.f32.gmra.mxu1 %v236_v16  ;;  %1079 = vmatprep.subr.mxu0 %v524_v17  ;;  %v567_v16 = vld [vmem:[%s2427_s27 + $0x630] sm:$0xff]  ;;  %v502_v17 = vld [vmem:[%s2427_s27 + $0x428] sm:$0xff] }
  0x5a   : > { %1240 = vmatprep.subr.mxu1 %v588_v18  ;;  %1080 = vmatpush1.msra.mxu0 %v523_v19  ;;  %v566_v18 = vld [vmem:[%s2427_s27 + $0x628] sm:$0xff]  ;;  %v289_v19 = vld [vmem:[%s3830_s1 + $0x200] sm:$0xff] }
  0x5b   : > { %1241 = vmatpush1.msra.mxu1 %v587_v20  ;;  %1081 = vmatprep.subr.mxu0 %v522_v21  ;;  %v291_v20 = vld [vmem:[%s3830_s1 + $0x210] sm:$0xff]  ;;  %v501_v21 = vld [vmem:[%s2427_s27 + $0x420] sm:$0xff] }
  0x5c   : > { %1242 = vmatprep.subr.mxu1 %v586_v22  ;;  %829 = vmatprep.mubr.f32.mxu0 %v244_v23  ;;  %v565_v22 = vld [vmem:[%s2427_s27 + $0x620] sm:$0xff]  ;;  %v288_v23 = vld [vmem:[%s3830_s1 + $0x1f8] sm:$0xff] }
  0x5d   : > { %990 = vmatprep.mubr.f32.mxu1 %v246_v24  ;;  %1082 = vmatpush1.msra.mxu0 %v521_v25  ;;  %v290_v24 = vld [vmem:[%s3830_s1 + $0x208] sm:$0xff]  ;;  %v500_v25 = vld [vmem:[%s2427_s27 + $0x418] sm:$0xff] }
  0x5e   : > { %1243 = vmatpush1.msra.mxu1 %v585_v26  ;;  %830 = vmatmul.mubr.f32.gmra.mxu0 %v243_v27  ;;  %v564_v26 = vld [vmem:[%s2427_s27 + $0x618] sm:$0xff]  ;;  %v499_v27 = vld [vmem:[%s2427_s27 + $0x410] sm:$0xff] }
  0x5f   : > { %991 = vmatmul.mubr.f32.gmra.mxu1 %v245_v28  ;;  %1083 = vmatprep.subr.mxu0 %v520_v29  ;;  %v563_v28 = vld [vmem:[%s2427_s27 + $0x610] sm:$0xff]  ;;  %v498_v29 = vld [vmem:[%s2427_s27 + $0x408] sm:$0xff] }
  0x60   : > { %1244 = vmatprep.subr.mxu1 %v584_v30  ;;  %1084 = vmatpush1.msra.mxu0 %v519_v31  ;;  %v562_v30 = vld [vmem:[%s2427_s27 + $0x608] sm:$0xff] }
  0x61   : > { %1245 = vmatpush1.msra.mxu1 %v583_v32  ;;  %1085 = vmatprep.subr.mxu0 %v518_v33  ;;  %v298_v31 = vld [vmem:[%s3830_s1 + $0x248] sm:$0xff]  ;;  %v300_v32 = vld [vmem:[%s3830_s1 + $0x258] sm:$0xff]  ;;  %v497_v33 = vld [vmem:[%s2427_s27 + $0x400] sm:$0xff] }
  0x62   : > { %1246 = vmatprep.subr.mxu1 %v582_v34  ;;  %835 = vmatprep.mubr.f32.mxu0 %v253_v35  ;;  %v561_v34 = vld [vmem:[%s2427_s27 + $0x600] sm:$0xff] }
  0x63   : > { %996 = vmatprep.mubr.f32.mxu1 %v255_v36  ;;  %1086 = vmatpush1.msra.mxu0 %v517_v37  ;;  %v297_v35 = vld [vmem:[%s3830_s1 + $0x240] sm:$0xff]  ;;  %v299_v36 = vld [vmem:[%s3830_s1 + $0x250] sm:$0xff]  ;;  %v560_v37 = vld [vmem:[%s2427_s27 + $0x5f8] sm:$0xff] }
  0x64   : > { %1247 = vmatpush1.msra.mxu1 %v581_v38  ;;  %836 = vmatmul.mubr.f32.gmra.mxu0 %v252_v39  ;;  %v624_v38 = vld [vmem:[%s2427_s27 + $0x7f8] sm:$0xff]  ;;  %v559_v39 = vld [vmem:[%s2427_s27 + $0x5f0] sm:$0xff] }
  0x65   : > { %997 = vmatmul.mubr.f32.gmra.mxu1 %v254_v40  ;;  %1087 = vmatprep.subr.mxu0 %v516_v41  ;;  %v623_v40 = vld [vmem:[%s2427_s27 + $0x7f0] sm:$0xff]  ;;  %v558_v41 = vld [vmem:[%s2427_s27 + $0x5e8] sm:$0xff] }
  0x66   : > { %1248 = vmatprep.subr.mxu1 %v580_v42  ;;  %1088 = vmatpush1.msra.mxu0 %v515_v43  ;;  %v622_v42 = vld [vmem:[%s2427_s27 + $0x7e8] sm:$0xff]  ;;  %v307_v43 = vld [vmem:[%s3830_s1 + $0x290] sm:$0xff] }
  0x67   : > { %1249 = vmatpush1.msra.mxu1 %v579_v44  ;;  %1089 = vmatprep.subr.mxu0 %v514_v45  ;;  %v309_v44 = vld [vmem:[%s3830_s1 + $0x2a0] sm:$0xff] }
  0x68   : > { %1250 = vmatprep.subr.mxu1 %v578_v46  ;;  %841 = vmatprep.mubr.f32.mxu0 %v262_v47  ;;  %v557_v45 = vld [vmem:[%s2427_s27 + $0x5e0] sm:$0xff]  ;;  %v306_v47 = vld [vmem:[%s3830_s1 + $0x288] sm:$0xff] }
  0x69   : > { %1002 = vmatprep.mubr.f32.mxu1 %v264_v48  ;;  %1090 = vmatpush1.msra.mxu0 %v513_v49  ;;  %v621_v46 = vld [vmem:[%s2427_s27 + $0x7e0] sm:$0xff]  ;;  %v308_v48 = vld [vmem:[%s3830_s1 + $0x298] sm:$0xff] }
  0x6a   : > { %1251 = vmatpush1.msra.mxu1 %v577_v50  ;;  %842 = vmatmul.mubr.f32.gmra.mxu0 %v261_v51  ;;  %v556_v49 = vld [vmem:[%s2427_s27 + $0x5d8] sm:$0xff]  ;;  %v555_v51 = vld [vmem:[%s2427_s27 + $0x5d0] sm:$0xff] }
  0x6b   : > { %1003 = vmatmul.mubr.f32.gmra.mxu1 %v263_v52  ;;  %1091 = vmatprep.subr.mxu0 %v512_v53  ;;  %v620_v50 = vld [vmem:[%s2427_s27 + $0x7d8] sm:$0xff]  ;;  %v619_v52 = vld [vmem:[%s2427_s27 + $0x7d0] sm:$0xff]  ;;  %v554_v53 = vld [vmem:[%s2427_s27 + $0x5c8] sm:$0xff] }
  0x6c   : > { %1252 = vmatprep.subr.mxu1 %v576_v54  ;;  %1092 = vmatpush1.msra.mxu0 %v511_v55  ;;  %v618_v54 = vld [vmem:[%s2427_s27 + $0x7c8] sm:$0xff]  ;;  %v316_v55 = vld [vmem:[%s3830_s1 + $0x2d8] sm:$0xff] }
  0x6d   : > { %1253 = vmatpush1.msra.mxu1 %v575_v56  ;;  %1093 = vmatprep.subr.mxu0 %v510_v57  ;;  %v318_v56 = vld [vmem:[%s3830_s1 + $0x2e8] sm:$0xff]  ;;  %v553_v57 = vld [vmem:[%s2427_s27 + $0x5c0] sm:$0xff] }
  0x6e   : > { %1254 = vmatprep.subr.mxu1 %v574_v58  ;;  %847 = vmatprep.mubr.f32.mxu0 %v271_v59  ;;  %v617_v58 = vld [vmem:[%s2427_s27 + $0x7c0] sm:$0xff]  ;;  %v315_v59 = vld [vmem:[%s3830_s1 + $0x2d0] sm:$0xff] }
  0x6f   : > { %1008 = vmatprep.mubr.f32.mxu1 %v273_v60  ;;  %1094 = vmatpush1.msra.mxu0 %v509_v61  ;;  %v317_v60 = vld [vmem:[%s3830_s1 + $0x2e0] sm:$0xff]  ;;  %v552_v61 = vld [vmem:[%s2427_s27 + $0x5b8] sm:$0xff] }
  0x70   : > { %1255 = vmatpush1.msra.mxu1 %v573_v62  ;;  %848 = vmatmul.mubr.f32.gmra.mxu0 %v270_v63  ;;  %v616_v62 = vld [vmem:[%s2427_s27 + $0x7b8] sm:$0xff] }
  0x71   : > { %1009 = vmatmul.mubr.f32.gmra.mxu1 %v272_v0  ;;  %1095 = vmatprep.subr.mxu0 %v508_v1  ;;  %v664_v63 = vld [vmem:[%s3831_s2 + $0x38] sm:$0xff]  ;;  %v551_v0 = vld [vmem:[%s2427_s27 + $0x5b0] sm:$0xff] }
  0x72   : > { %1256 = vmatprep.subr.mxu1 %v572_v2  ;;  %1096 = vmatpush1.msra.mxu0 %v507_v3  ;;  %v615_v1 = vld [vmem:[%s2427_s27 + $0x7b0] sm:$0xff]  ;;  %v550_v2 = vld [vmem:[%s2427_s27 + $0x5a8] sm:$0xff] }
  0x73   : > { %1257 = vmatpush1.msra.mxu1 %v571_v4  ;;  %1097 = vmatprep.subr.mxu0 %v506_v5  ;;  %v614_v3 = vld [vmem:[%s2427_s27 + $0x7a8] sm:$0xff]  ;;  %v325_v4 = vld [vmem:[%s3830_s1 + $0x320] sm:$0xff]  ;;  %v327_v5 = vld [vmem:[%s3830_s1 + $0x330] sm:$0xff] }
  0x74   : > { %1258 = vmatprep.subr.mxu1 %v570_v6  ;;  %853 = vmatprep.mubr.f32.mxu0 %v280_v7  ;;  %v549_v6 = vld [vmem:[%s2427_s27 + $0x5a0] sm:$0xff] }
  0x75   : > { %1014 = vmatprep.mubr.f32.mxu1 %v282_v8  ;;  %1098 = vmatpush1.msra.mxu0 %v505_v9  ;;  %v613_v7 = vld [vmem:[%s2427_s27 + $0x7a0] sm:$0xff]  ;;  %v324_v8 = vld [vmem:[%s3830_s1 + $0x318] sm:$0xff]  ;;  %v326_v9 = vld [vmem:[%s3830_s1 + $0x328] sm:$0xff] }
  0x76   : > { %1259 = vmatpush1.msra.mxu1 %v569_v10  ;;  %854 = vmatmul.mubr.f32.gmra.mxu0 %v279_v11  ;;  %v548_v10 = vld [vmem:[%s2427_s27 + $0x598] sm:$0xff] }
  0x77   : > { %1015 = vmatmul.mubr.f32.gmra.mxu1 %v281_v12  ;;  %1099 = vmatprep.subr.mxu0 %v504_v13  ;;  %v612_v11 = vld [vmem:[%s2427_s27 + $0x798] sm:$0xff]  ;;  %v547_v13 = vld [vmem:[%s2427_s27 + $0x590] sm:$0xff] }
  0x78   : > { %1260 = vmatprep.subr.mxu1 %v568_v14  ;;  %1100 = vmatpush1.msra.mxu0 %v503_v15  ;;  %v672_v12 = vld [vmem:[%s3831_s2 + $0x78] sm:$0xff]  ;;  %v611_v14 = vld [vmem:[%s2427_s27 + $0x790] sm:$0xff]  ;;  %v546_v15 = vld [vmem:[%s2427_s27 + $0x588] sm:$0xff] }
  0x79   : > { %1261 = vmatpush1.msra.mxu1 %v567_v16  ;;  %1101 = vmatprep.subr.mxu0 %v502_v17  ;;  %v610_v16 = vld [vmem:[%s2427_s27 + $0x788] sm:$0xff] }
  0x7a   : > { %1262 = vmatprep.subr.mxu1 %v566_v18  ;;  %859 = vmatprep.mubr.f32.mxu0 %v289_v19  ;;  %v334_v17 = vld [vmem:[%s3830_s1 + $0x368] sm:$0xff]  ;;  %v336_v18 = vld [vmem:[%s3830_s1 + $0x378] sm:$0xff]  ;;  %v545_v19 = vld [vmem:[%s2427_s27 + $0x580] sm:$0xff] }
  0x7b   : > { %1020 = vmatprep.mubr.f32.mxu1 %v291_v20  ;;  %1102 = vmatpush1.msra.mxu0 %v501_v21  ;;  %v609_v20 = vld [vmem:[%s2427_s27 + $0x780] sm:$0xff] }
  0x7c   : > { %1263 = vmatpush1.msra.mxu1 %v565_v22  ;;  %860 = vmatmul.mubr.f32.gmra.mxu0 %v288_v23  ;;  %v333_v21 = vld [vmem:[%s3830_s1 + $0x360] sm:$0xff]  ;;  %v335_v22 = vld [vmem:[%s3830_s1 + $0x370] sm:$0xff]  ;;  %v544_v23 = vld [vmem:[%s2427_s27 + $0x578] sm:$0xff] }
  0x7d   : > { %1021 = vmatmul.mubr.f32.gmra.mxu1 %v290_v24  ;;  %1103 = vmatprep.subr.mxu0 %v500_v25  ;;  %v608_v24 = vld [vmem:[%s2427_s27 + $0x778] sm:$0xff]  ;;  %v662_v25 = vld [vmem:[%s3831_s2 + $0x28] sm:$0xff] }
  0x7e   : > { %1264 = vmatprep.subr.mxu1 %v564_v26  ;;  %1104 = vmatpush1.msra.mxu0 %v499_v27  ;;  %v543_v26 = vld [vmem:[%s2427_s27 + $0x570] sm:$0xff] }
  0x7f   : > { %1265 = vmatpush1.msra.mxu1 %v563_v28  ;;  %1105 = vmatprep.subr.mxu0 %v498_v29  ;;  %v607_v27 = vld [vmem:[%s2427_s27 + $0x770] sm:$0xff]  ;;  %v542_v28 = vld [vmem:[%s2427_s27 + $0x568] sm:$0xff] }
  0x80   : > { %1266 = vmatprep.subr.mxu1 %v562_v30  ;;  %865 = vmatprep.mubr.f32.mxu0 %v298_v31  ;;  %v606_v29 = vld [vmem:[%s2427_s27 + $0x768] sm:$0xff]  ;;  %v343_v30 = vld [vmem:[%s3830_s1 + $0x3b0] sm:$0xff]  ;;  %v345_v31 = vld [vmem:[%s3830_s1 + $0x3c0] sm:$0xff] }
  0x81   : > { %1026 = vmatprep.mubr.f32.mxu1 %v300_v32  ;;  %1106 = vmatpush1.msra.mxu0 %v497_v33  ;;  %v541_v32 = vld [vmem:[%s2427_s27 + $0x560] sm:$0xff] }
  0x82   : > { %1267 = vmatpush1.msra.mxu1 %v561_v34  ;;  %866 = vmatmul.mubr.f32.gmra.mxu0 %v297_v35  ;;  %v605_v33 = vld [vmem:[%s2427_s27 + $0x760] sm:$0xff]  ;;  %v342_v34 = vld [vmem:[%s3830_s1 + $0x3a8] sm:$0xff]  ;;  %v344_v35 = vld [vmem:[%s3830_s1 + $0x3b8] sm:$0xff] }
  0x83   : > { %1027 = vmatmul.mubr.f32.gmra.mxu1 %v299_v36  ;;  %1107 = vmatprep.subr.mxu0 %v560_v37  ;;  %v540_v36 = vld [vmem:[%s2427_s27 + $0x558] sm:$0xff] }
  0x84   : > { %1268 = vmatprep.subr.mxu1 %v624_v38  ;;  %1108 = vmatpush2.msra.mxu0 %v559_v39  ;;  %v604_v37 = vld [vmem:[%s2427_s27 + $0x758] sm:$0xff]  ;;  %v661_v38 = vld [vmem:[%s3831_s2 + $0x20] sm:$0xff]  ;;  %v539_v39 = vld [vmem:[%s2427_s27 + $0x550] sm:$0xff] }
  0x85   : > { %1269 = vmatpush2.msra.mxu1 %v623_v40  ;;  %1109 = vmatprep.subr.mxu0 %v558_v41  ;;  %v603_v40 = vld [vmem:[%s2427_s27 + $0x750] sm:$0xff]  ;;  %v538_v41 = vld [vmem:[%s2427_s27 + $0x548] sm:$0xff] }
  0x86   : > { %1270 = vmatprep.subr.mxu1 %v622_v42  ;;  %871 = vmatprep.mubr.f32.mxu0 %v307_v43  ;;  %v602_v42 = vld [vmem:[%s2427_s27 + $0x748] sm:$0xff]  ;;  %v352_v43 = vld [vmem:[%s3830_s1 + $0x3f8] sm:$0xff] }
  0x87   : > { %1032 = vmatprep.mubr.f32.mxu1 %v309_v44  ;;  %1110 = vmatpush2.msra.mxu0 %v557_v45  ;;  %v354_v44 = vld [vmem:[%s3830_s1 + $0x408] sm:$0xff]  ;;  %v537_v45 = vld [vmem:[%s2427_s27 + $0x540] sm:$0xff] }
  0x88   : > { %1271 = vmatpush2.msra.mxu1 %v621_v46  ;;  %872 = vmatmul.mubr.f32.gmra.mxu0 %v306_v47  ;;  %v601_v46 = vld [vmem:[%s2427_s27 + $0x740] sm:$0xff]  ;;  %v351_v47 = vld [vmem:[%s3830_s1 + $0x3f0] sm:$0xff] }
  0x89   : > { %1033 = vmatmul.mubr.f32.gmra.mxu1 %v308_v48  ;;  %1111 = vmatprep.subr.mxu0 %v556_v49  ;;  %v353_v48 = vld [vmem:[%s3830_s1 + $0x400] sm:$0xff]  ;;  %v536_v49 = vld [vmem:[%s2427_s27 + $0x538] sm:$0xff] }
  0x8a   : > { %1272 = vmatprep.subr.mxu1 %v620_v50  ;;  %1112 = vmatpush2.msra.mxu0 %v555_v51  ;;  %v600_v50 = vld [vmem:[%s2427_s27 + $0x738] sm:$0xff] }
  0x8b   : > { %1273 = vmatpush2.msra.mxu1 %v619_v52  ;;  %1113 = vmatprep.subr.mxu0 %v554_v53  ;;  %v660_v51 = vld [vmem:[%s3831_s2 + $0x18] sm:$0xff]  ;;  %v535_v52 = vld [vmem:[%s2427_s27 + $0x530] sm:$0xff] }
  0x8c   : > { %1274 = vmatprep.subr.mxu1 %v618_v54  ;;  %877 = vmatprep.mubr.f32.mxu0 %v316_v55  ;;  %v599_v53 = vld [vmem:[%s2427_s27 + $0x730] sm:$0xff]  ;;  %v534_v54 = vld [vmem:[%s2427_s27 + $0x528] sm:$0xff] }
  0x8d   : > { %1038 = vmatprep.mubr.f32.mxu1 %v318_v56  ;;  %1114 = vmatpush2.msra.mxu0 %v553_v57  ;;  %v598_v55 = vld [vmem:[%s2427_s27 + $0x728] sm:$0xff]  ;;  %v361_v56 = vld [vmem:[%s3830_s1 + $0x440] sm:$0xff]  ;;  %v363_v57 = vld [vmem:[%s3830_s1 + $0x450] sm:$0xff] }
  0x8e   : > { %1275 = vmatpush2.msra.mxu1 %v617_v58  ;;  %878 = vmatmul.mubr.f32.gmra.mxu0 %v315_v59  ;;  %v533_v58 = vld [vmem:[%s2427_s27 + $0x520] sm:$0xff] }
  0x8f   : > { %1039 = vmatmul.mubr.f32.gmra.mxu1 %v317_v60  ;;  %1115 = vmatprep.subr.mxu0 %v552_v61  ;;  %v597_v59 = vld [vmem:[%s2427_s27 + $0x720] sm:$0xff]  ;;  %v360_v60 = vld [vmem:[%s3830_s1 + $0x438] sm:$0xff]  ;;  %v362_v61 = vld [vmem:[%s3830_s1 + $0x448] sm:$0xff] }
  0x90   : > { %1276 = vmatprep.subr.mxu1 %v616_v62  ;;  %710 = vperm.xlu0 %2333, %v664_v63   ;;  %v532_v62 = vld [vmem:[%s2427_s27 + $0x518] sm:$0xff] }
  0x91   : > { %1116 = vmatpush2.msra.mxu0 %v551_v0  ;;  %1277 = vmatpush2.msra.mxu1 %v615_v1  ;;  %v596_v63 = vld [vmem:[%s2427_s27 + $0x718] sm:$0xff]  ;;  %v659_v0 = vld [vmem:[%s3831_s2 + $0x10] sm:$0xff] }
  0x92   : > { %1117 = vmatprep.subr.mxu0 %v550_v2  ;;  %1278 = vmatprep.subr.mxu1 %v614_v3  ;;  %v531_v1 = vld [vmem:[%s2427_s27 + $0x510] sm:$0xff]  ;;  %v530_v3 = vld [vmem:[%s2427_s27 + $0x508] sm:$0xff] }
  0x93   : > { %883 = vmatprep.mubr.f32.mxu0 %v325_v4  ;;  %1044 = vmatprep.mubr.f32.mxu1 %v327_v5  ;;  %v595_v2 = vld [vmem:[%s2427_s27 + $0x710] sm:$0xff]  ;;  %v594_v4 = vld [vmem:[%s2427_s27 + $0x708] sm:$0xff]  ;;  %v529_v5 = vld [vmem:[%s2427_s27 + $0x500] sm:$0xff] }
  0x94   : > { %1118 = vmatpush2.msra.mxu0 %v549_v6  ;;  %1279 = vmatpush2.msra.mxu1 %v613_v7  ;;  %v230_v6 = vld [vmem:[%s3830_s1 + $0x28] sm:$0xff]  ;;  %v593_v7 = vld [vmem:[%s2427_s27 + $0x700] sm:$0xff] }
  0x95   : > { %884 = vmatmul.mubr.f32.gmra.mxu0 %v324_v8  ;;  %1045 = vmatmul.mubr.f32.gmra.mxu1 %v326_v9  ;;  %v232_v8 = vld [vmem:[%s3830_s1 + $0x38] sm:$0xff]  ;;  %v229_v9 = vld [vmem:[%s3830_s1 + $0x20] sm:$0xff] }
  0x96   : > { %1119 = vmatprep.subr.mxu0 %v548_v10  ;;  %1280 = vmatprep.subr.mxu1 %v612_v11  ;;  %v231_v10 = vld [vmem:[%s3830_s1 + $0x30] sm:$0xff]  ;;  %v656_v11 = vld [vmem:[%s2427_s27 + $0x8f8] sm:$0xff] }
  0x97   : > { %750 = vperm.xlu0 %2333, %v672_v12   ;;  %1120 = vmatpush2.msra.mxu0 %v547_v13  ;;  %v658_v12 = vld [vmem:[%s3831_s2 + $0x8] sm:$0xff]  ;;  %v655_v13 = vld [vmem:[%s2427_s27 + $0x8f0] sm:$0xff] }
  0x98   : > { %1281 = vmatpush2.msra.mxu1 %v611_v14  ;;  %1121 = vmatprep.subr.mxu0 %v546_v15  ;;  %v239_v14 = vld [vmem:[%s3830_s1 + $0x70] sm:$0xff]  ;;  %v241_v15 = vld [vmem:[%s3830_s1 + $0x80] sm:$0xff] }
  0x99   : > { %1282 = vmatprep.subr.mxu1 %v610_v16  ;;  %889 = vmatprep.mubr.f32.mxu0 %v334_v17  ;;  %v2913_v16 = vld [vmem:[%s2427_s27 + $0x8e8] sm:$0xff] }
  0x9a   : > { %1050 = vmatprep.mubr.f32.mxu1 %v336_v18  ;;  %1122 = vmatpush2.msra.mxu0 %v545_v19  ;;  %v238_v17 = vld [vmem:[%s3830_s1 + $0x68] sm:$0xff]  ;;  %v240_v18 = vld [vmem:[%s3830_s1 + $0x78] sm:$0xff]  ;;  %v657_v19 = vld [vmem:[%s3831_s2] sm:$0xff] }
  0x9b   : > { %1283 = vmatpush2.msra.mxu1 %v609_v20  ;;  %890 = vmatmul.mubr.f32.gmra.mxu0 %v333_v21  ;;  %v2925_v20 = vld [vmem:[%s2427_s27 + $0x8e0] sm:$0xff]  ;;  %v248_v21 = vld [vmem:[%s3830_s1 + $0xb8] sm:$0xff] }
  0x9c   : > { %1051 = vmatmul.mubr.f32.gmra.mxu1 %v335_v22  ;;  %1123 = vmatprep.subr.mxu0 %v544_v23  ;;  %v250_v22 = vld [vmem:[%s3830_s1 + $0xc8] sm:$0xff]  ;;  %v2935_v23 = vld [vmem:[%s2427_s27 + $0x8d8] sm:$0xff] }
  0x9d   : > { %1284 = vmatprep.subr.mxu1 %v608_v24  ;;  %700 = vperm.xlu0 %2333, %v662_v25   ;;  %v663_v24 = vld [vmem:[%s3831_s2 + $0x30] sm:$0xff] }
  0x9e   : > { %1124 = vmatpush2.msra.mxu0 %v543_v26  ;;  %1285 = vmatpush2.msra.mxu1 %v607_v27  ;;  %v247_v25 = vld [vmem:[%s3830_s1 + $0xb0] sm:$0xff]  ;;  %v249_v26 = vld [vmem:[%s3830_s1 + $0xc0] sm:$0xff] }
  0x9f   : > { %1125 = vmatprep.subr.mxu0 %v542_v28  ;;  %1286 = vmatprep.subr.mxu1 %v606_v29  ;;  %v2948_v27 = vld [vmem:[%s2427_s27 + $0x8d0] sm:$0xff]  ;;  %v257_v28 = vld [vmem:[%s3830_s1 + $0x100] sm:$0xff] }
  0xa0   : > { %895 = vmatprep.mubr.f32.mxu0 %v343_v30  ;;  %1056 = vmatprep.mubr.f32.mxu1 %v345_v31  ;;  %v259_v29 = vld [vmem:[%s3830_s1 + $0x110] sm:$0xff]  ;;  %v2958_v30 = vld [vmem:[%s2427_s27 + $0x8c8] sm:$0xff] }
  0xa1   : > { %1126 = vmatpush2.msra.mxu0 %v541_v32  ;;  %1287 = vmatpush2.msra.mxu1 %v605_v33  ;;  %v671_v31 = vld [vmem:[%s3831_s2 + $0x70] sm:$0xff]  ;;  %v2964_v32 = vld [vmem:[%s2427_s27 + $0x8c0] sm:$0xff]  ;;  %v256_v33 = vld [vmem:[%s3830_s1 + $0xf8] sm:$0xff] }
  0xa2   : > { %896 = vmatmul.mubr.f32.gmra.mxu0 %v342_v34  ;;  %1057 = vmatmul.mubr.f32.gmra.mxu1 %v344_v35  ;;  %v258_v34 = vld [vmem:[%s3830_s1 + $0x108] sm:$0xff] }
  0xa3   : > { %1127 = vmatprep.subr.mxu0 %v540_v36  ;;  %1288 = vmatprep.subr.mxu1 %v604_v37  ;;  %v266_v35 = vld [vmem:[%s3830_s1 + $0x148] sm:$0xff]  ;;  %v268_v36 = vld [vmem:[%s3830_s1 + $0x158] sm:$0xff] }
  0xa4   : > { %695 = vperm.xlu0 %2333, %v661_v38   ;;  %1128 = vmatpush2.msra.mxu0 %v539_v39  ;;  %v2982_v37 = vld [vmem:[%s2427_s27 + $0x8b8] sm:$0xff]  ;;  %v670_v38 = vld [vmem:[%s3831_s2 + $0x68] sm:$0xff]  ;;  %v265_v39 = vld [vmem:[%s3830_s1 + $0x140] sm:$0xff] }
  0xa5   : > { %1289 = vmatpush2.msra.mxu1 %v603_v40  ;;  %1129 = vmatprep.subr.mxu0 %v538_v41  ;;  %v267_v40 = vld [vmem:[%s3830_s1 + $0x150] sm:$0xff] }
  0xa6   : > { %1290 = vmatprep.subr.mxu1 %v602_v42  ;;  %901 = vmatprep.mubr.f32.mxu0 %v352_v43  ;;  %v2995_v41 = vld [vmem:[%s2427_s27 + $0x8b0] sm:$0xff]  ;;  %v277_v43 = vld [vmem:[%s3830_s1 + $0x1a0] sm:$0xff] }
  0xa7   : > { %1062 = vmatprep.mubr.f32.mxu1 %v354_v44  ;;  %1130 = vmatpush2.msra.mxu0 %v537_v45  ;;  %v275_v42 = vld [vmem:[%s3830_s1 + $0x190] sm:$0xff]  ;;  %v3004_v44 = vld [vmem:[%s2427_s27 + $0x8a8] sm:$0xff]  ;;  %v669_v45 = vld [vmem:[%s3831_s2 + $0x60] sm:$0xff] }
  0xa8   : > { %1291 = vmatpush2.msra.mxu1 %v601_v46  ;;  %902 = vmatmul.mubr.f32.gmra.mxu0 %v351_v47  ;;  %v274_v46 = vld [vmem:[%s3830_s1 + $0x188] sm:$0xff]  ;;  %v276_v47 = vld [vmem:[%s3830_s1 + $0x198] sm:$0xff] }
  0xa9   : > { %1063 = vmatmul.mubr.f32.gmra.mxu1 %v353_v48  ;;  %1131 = vmatprep.subr.mxu0 %v536_v49  ;;  %v3018_v48 = vld [vmem:[%s2427_s27 + $0x8a0] sm:$0xff]  ;;  %v284_v49 = vld [vmem:[%s3830_s1 + $0x1d8] sm:$0xff] }
  0xaa   : > { %1292 = vmatprep.subr.mxu1 %v600_v50  ;;  %690 = vperm.xlu0 %2333, %v660_v51   ;;  %v286_v50 = vld [vmem:[%s3830_s1 + $0x1e8] sm:$0xff]  ;;  %v3028_v51 = vld [vmem:[%s2427_s27 + $0x898] sm:$0xff] }
  0xab   : > { %1132 = vmatpush2.msra.mxu0 %v535_v52  ;;  %1293 = vmatpush2.msra.mxu1 %v599_v53  ;;  %v283_v52 = vld [vmem:[%s3830_s1 + $0x1d0] sm:$0xff]  ;;  %v285_v53 = vld [vmem:[%s3830_s1 + $0x1e0] sm:$0xff] }
  0xac   : > { %1133 = vmatprep.subr.mxu0 %v534_v54  ;;  %1294 = vmatprep.subr.mxu1 %v598_v55  ;;  %v668_v54 = vld [vmem:[%s3831_s2 + $0x58] sm:$0xff]  ;;  %v3044_v55 = vld [vmem:[%s2427_s27 + $0x890] sm:$0xff] }
  0xad   : > { %907 = vmatprep.mubr.f32.mxu0 %v361_v56  ;;  %1068 = vmatprep.mubr.f32.mxu1 %v363_v57  ;;  %v293_v56 = vld [vmem:[%s3830_s1 + $0x220] sm:$0xff]  ;;  %v295_v57 = vld [vmem:[%s3830_s1 + $0x230] sm:$0xff] }
  0xae   : > { %1134 = vmatpush2.msra.mxu0 %v533_v58  ;;  %1295 = vmatpush2.msra.mxu1 %v597_v59  ;;  %v292_v58 = vld [vmem:[%s3830_s1 + $0x218] sm:$0xff]  ;;  %v294_v59 = vld [vmem:[%s3830_s1 + $0x228] sm:$0xff] }
  0xaf   : > { %908 = vmatmul.mubr.f32.gmra.mxu0 %v360_v60  ;;  %1069 = vmatmul.mubr.f32.gmra.mxu1 %v362_v61  ;;  %v3061_v60 = vld [vmem:[%s2427_s27 + $0x888] sm:$0xff]  ;;  %v667_v61 = vld [vmem:[%s3831_s2 + $0x50] sm:$0xff] }
  0xb0   : > { %1135 = vmatprep.subr.mxu0 %v532_v62  ;;  %1296 = vmatprep.subr.mxu1 %v596_v63  ;;  %v3068_v62 = vld [vmem:[%s2427_s27 + $0x880] sm:$0xff]  ;;  %v302_v63 = vld [vmem:[%s3830_s1 + $0x268] sm:$0xff] }
  0xb1   : > { %685 = vperm.xlu0 %2333, %v659_v0   ;;  %1136 = vmatpush2.msra.mxu0 %v531_v1  ;;  %v304_v0 = vld [vmem:[%s3830_s1 + $0x278] sm:$0xff]  ;;  %v301_v1 = vld [vmem:[%s3830_s1 + $0x260] sm:$0xff] }
  0xb2   : > { %1297 = vmatpush2.msra.mxu1 %v595_v2  ;;  %1137 = vmatprep.subr.mxu0 %v530_v3  ;;  %v303_v2 = vld [vmem:[%s3830_s1 + $0x270] sm:$0xff]  ;;  %v3086_v3 = vld [vmem:[%s2427_s27 + $0x878] sm:$0xff] }
  0xb3   : > { %1298 = vmatprep.subr.mxu1 %v594_v4  ;;  %1138 = vmatpush2.msra.mxu0 %v529_v5  ;;  %v666_v4 = vld [vmem:[%s3831_s2 + $0x48] sm:$0xff]  ;;  %v3092_v5 = vld [vmem:[%s2427_s27 + $0x870] sm:$0xff] }
  0xb4   : > { %1139 = vmatprep.mubr.f32.mxu0 %v230_v6  ;;  %1299 = vmatpush2.msra.mxu1 %v593_v7  ;;  %v311_v6 = vld [vmem:[%s3830_s1 + $0x2b0] sm:$0xff]  ;;  %v313_v7 = vld [vmem:[%s3830_s1 + $0x2c0] sm:$0xff] }
  0xb5   : > { %1300 = vmatprep.mubr.f32.mxu1 %v232_v8  ;;  %1140 = vmatmul.mubr.f32.vlgmr.msra.gmra.mxu0 %v229_v9  ;;  %v310_v8 = vld [vmem:[%s3830_s1 + $0x2a8] sm:$0xff]  ;;  %v312_v9 = vld [vmem:[%s3830_s1 + $0x2b8] sm:$0xff] }
  0xb6   : > { %1301 = vmatmul.mubr.f32.vlgmr.msra.gmra.mxu1 %v231_v10  ;;  %1397 = vmatprep.subr.mxu0 %v656_v11  ;;  %v638_v10 = vld [vmem:[%s2427_s27 + $0x868] sm:$0xff] }
  0xb7   : > { %680 = vperm.xlu0 %2333, %v658_v12   ;;  %1398 = vmatpush1.msra.mxu0 %v655_v13  ;;  %v637_v12 = vld [vmem:[%s2427_s27 + $0x860] sm:$0xff] }
  0xb8   : > { %1145 = vmatprep.mubr.f32.mxu0 %v239_v14  ;;  %1306 = vmatprep.mubr.f32.mxu1 %v241_v15  ;;  %v322_v14 = vld [vmem:[%s3830_s1 + $0x308] sm:$0xff]  ;;  %v319_v15 = vld [vmem:[%s3830_s1 + $0x2f0] sm:$0xff] }
  0xb9   : > { %1399 = vmatprep.subr.mxu0 %v2913_v16  ;;  %1146 = vmatmul.mubr.f32.gmra.mxu0 %v238_v17  ;;  %v636_v17 = vld [vmem:[%s2427_s27 + $0x858] sm:$0xff] }
  0xba   : > { %1307 = vmatmul.mubr.f32.gmra.mxu1 %v240_v18  ;;  %1400 = vmatpush1.msra.mxu0 %v2925_v20  ;;  %v635_v18 = vld [vmem:[%s2427_s27 + $0x850] sm:$0xff] }
  0xbb   : > { %675 = vperm.xlu0 %2333, %v657_v19   ;;  %1151 = vmatprep.mubr.f32.mxu0 %v248_v21  ;;  %v329_v19 = vld [vmem:[%s3830_s1 + $0x340] sm:$0xff]  ;;  %v328_v21 = vld [vmem:[%s3830_s1 + $0x338] sm:$0xff] }
  0xbc   : > { %1312 = vmatprep.mubr.f32.mxu1 %v250_v22  ;;  %1401 = vmatprep.subr.mxu0 %v2935_v23  ;;  %v330_v22 = vld [vmem:[%s3830_s1 + $0x348] sm:$0xff] }
  0xbd   : > { %705 = vperm.xlu1 %2334, %v663_v24   ;;  %1152 = vmatmul.mubr.f32.gmra.mxu0 %v247_v25  ;;  %v633_v24 = vld [vmem:[%s2427_s27 + $0x840] sm:$0xff]  ;;  %v338_v25 = vld [vmem:[%s3830_s1 + $0x388] sm:$0xff] }
  0xbe   : > { %1313 = vmatmul.mubr.f32.gmra.mxu1 %v249_v26  ;;  %1402 = vmatpush1.msra.mxu0 %v2948_v27  ;;  %v340_v26 = vld [vmem:[%s3830_s1 + $0x398] sm:$0xff] }
  0xbf   : > { %1157 = vmatprep.mubr.f32.mxu0 %v257_v28  ;;  %1318 = vmatprep.mubr.f32.mxu1 %v259_v29  ;;  %v339_v28 = vld [vmem:[%s3830_s1 + $0x390] sm:$0xff]  ;;  %v632_v29 = vld [vmem:[%s2427_s27 + $0x838] sm:$0xff] }
  0xc0   : > { %1403 = vmatprep.subr.mxu0 %v2958_v30  ;;  %2290 = vmatprep.subr.mxu1 %v656_v11  ;;  %v665_v11 = vld [vmem:[%s3831_s2 + $0x40] sm:$0xff] }
  0xc1   : > { %745 = vperm.xlu1 %2334, %v671_v31   ;;  %1404 = vmatpush1.msra.mxu0 %v2964_v32  ;;  %v347_v31 = vld [vmem:[%s3830_s1 + $0x3d0] sm:$0xff] }
  0xc2   : > { %1158 = vmatmul.mubr.f32.gmra.mxu0 %v256_v33  ;;  %1319 = vmatmul.mubr.f32.gmra.mxu1 %v258_v34  ;;  %v346_v33 = vld [vmem:[%s3830_s1 + $0x3c8] sm:$0xff]  ;;  %v348_v34 = vld [vmem:[%s3830_s1 + $0x3d8] sm:$0xff] }
  0xc3   : > { %1163 = vmatprep.mubr.f32.mxu0 %v266_v35  ;;  %1324 = vmatprep.mubr.f32.mxu1 %v268_v36  ;;  %v630_v35 = vld [vmem:[%s2427_s27 + $0x828] sm:$0xff]  ;;  %v629_v36 = vld [vmem:[%s2427_s27 + $0x820] sm:$0xff] }
  0xc4   : > { %1405 = vmatprep.subr.mxu0 %v2982_v37  ;;  %2306 = vmatpush1.msra.mxu1 %v655_v13  ;;  %v320_v13 = vld [vmem:[%s3830_s1 + $0x2f8] sm:$0xff] }
  0xc5   : > { %740 = vperm.xlu1 %2334, %v670_v38   ;;  %1406 = vmatpush1.msra.mxu0 %v2995_v41  ;;  %v358_v38 = vld [vmem:[%s3830_s1 + $0x428] sm:$0xff] }
  0xc6   : > { %1164 = vmatmul.mubr.f32.gmra.mxu0 %v265_v39  ;;  %1325 = vmatmul.mubr.f32.gmra.mxu1 %v267_v40  ;;  %v355_v39 = vld [vmem:[%s3830_s1 + $0x410] sm:$0xff]  ;;  %v357_v40 = vld [vmem:[%s3830_s1 + $0x420] sm:$0xff] }
  0xc7   : > { %1169 = vmatprep.mubr.f32.mxu0 %v275_v42  ;;  %1330 = vmatprep.mubr.f32.mxu1 %v277_v43  ;;  %v627_v42 = vld [vmem:[%s2427_s27 + $0x810] sm:$0xff]  ;;  %v365_v43 = vld [vmem:[%s3830_s1 + $0x460] sm:$0xff] }
  0xc8   : > { %2291 = vmatprep.subr.mxu1 %v2913_v16  ;;  %1407 = vmatprep.subr.mxu0 %v3004_v44  ;;  %v321_v16 = vld [vmem:[%s3830_s1 + $0x300] sm:$0xff] }
  0xc9   : > { %735 = vperm.xlu1 %2334, %v669_v45   ;;  %2307 = vmatpush1.msra.mxu1 %v2925_v20  ;;  %v331_v20 = vld [vmem:[%s3830_s1 + $0x350] sm:$0xff]  ;;  %v364_v45 = vld [vmem:[%s3830_s1 + $0x458] sm:$0xff] }
  0xca   : > { %1170 = vmatmul.mubr.f32.gmra.mxu0 %v274_v46  ;;  %1331 = vmatmul.mubr.f32.gmra.mxu1 %v276_v47  ;;  %v366_v46 = vld [vmem:[%s3830_s1 + $0x468] sm:$0xff] }
  0xcb   : > { %1408 = vmatpush1.msra.mxu0 %v3018_v48  ;;  %1175 = vmatprep.mubr.f32.mxu0 %v284_v49  ;;  %v626_v47 = vld [vmem:[%s2427_s27 + $0x808] sm:$0xff]  ;;  %v233_v49 = vld [vmem:[%s3830_s1 + $0x40] sm:$0xff] }
  0xcc   : > { %1336 = vmatprep.mubr.f32.mxu1 %v286_v50  ;;  %2292 = vmatprep.subr.mxu1 %v2935_v23  ;;  %v634_v23 = vld [vmem:[%s2427_s27 + $0x848] sm:$0xff]  ;;  %v341_v50 = vld [vmem:[%s3830_s1 + $0x3a0] sm:$0xff] }
  0xcd   : > { %1409 = vmatprep.subr.mxu0 %v3028_v51  ;;  %730 = vperm.xlu1 %2334, %v668_v54   ;;  %v251_v54 = vld [vmem:[%s3830_s1 + $0xd0] sm:$0xff] }
  0xce   : > { %1176 = vmatmul.mubr.f32.gmra.mxu0 %v283_v52  ;;  %1337 = vmatmul.mubr.f32.gmra.mxu1 %v285_v53  ;;  %v242_v52 = vld [vmem:[%s3830_s1 + $0x88] sm:$0xff] }
  0xcf   : > { %2308 = vmatpush1.msra.mxu1 %v2948_v27  ;;  %1410 = vmatpush1.msra.mxu0 %v3044_v55  ;;  %v337_v27 = vld [vmem:[%s3830_s1 + $0x380] sm:$0xff]  ;;  %v350_v53 = vld [vmem:[%s3830_s1 + $0x3e8] sm:$0xff] }
  0xd0   : > { %1181 = vmatprep.mubr.f32.mxu0 %v293_v56  ;;  %1342 = vmatprep.mubr.f32.mxu1 %v295_v57  ;;  %v260_v56 = vld [vmem:[%s3830_s1 + $0x118] sm:$0xff] }
  0xd1   : > { %2293 = vmatprep.subr.mxu1 %v2958_v30  ;;  %1411 = vmatprep.subr.mxu0 %v3061_v60  ;;  %v631_v30 = vld [vmem:[%s2427_s27 + $0x830] sm:$0xff]  ;;  %v368_v57 = vld [vmem:[%s3830_s1 + $0x478] sm:$0xff] }
  0xd2   : > { %1182 = vmatmul.mubr.f32.gmra.mxu0 %v292_v58  ;;  %1343 = vmatmul.mubr.f32.gmra.mxu1 %v294_v59  ;;  %v269_v58 = vld [vmem:[%s3830_s1 + $0x160] sm:$0xff]  ;;  %v278_v59 = vld [vmem:[%s3830_s1 + $0x1a8] sm:$0xff] }
  0xd3   : > { %725 = vperm.xlu1 %2334, %v667_v61   ;;  %2309 = vmatpush1.msra.mxu1 %v2964_v32  ;;  %v349_v32 = vld [vmem:[%s3830_s1 + $0x3e0] sm:$0xff]  ;;  %v287_v61 = vld [vmem:[%s3830_s1 + $0x1f0] sm:$0xff] }
  0xd4   : > { %1412 = vmatpush1.msra.mxu0 %v3068_v62  ;;  %1187 = vmatprep.mubr.f32.mxu0 %v302_v63 }
  0xd5   : > { %1348 = vmatprep.mubr.f32.mxu1 %v304_v0  ;;  %2294 = vmatprep.subr.mxu1 %v2982_v37  ;;  %v356_v37 = vld [vmem:[%s3830_s1 + $0x418] sm:$0xff] }
  0xd6   : > { %1188 = vmatmul.mubr.f32.gmra.mxu0 %v301_v1  ;;  %1349 = vmatmul.mubr.f32.gmra.mxu1 %v303_v2  ;;  %v296_v0 = vld [vmem:[%s3830_s1 + $0x238] sm:$0xff] }
  0xd7   : > { %1413 = vmatprep.subr.mxu0 %v3086_v3  ;;  %720 = vperm.xlu1 %2334, %v666_v4   ;;  %v305_v4 = vld [vmem:[%s3830_s1 + $0x280] sm:$0xff] }
  0xd8   : > { %2310 = vmatpush1.msra.mxu1 %v2995_v41  ;;  %1414 = vmatpush1.msra.mxu0 %v3092_v5  ;;  %v628_v41 = vld [vmem:[%s2427_s27 + $0x818] sm:$0xff] }
  0xd9   : > { %1193 = vmatprep.mubr.f32.mxu0 %v311_v6  ;;  %1354 = vmatprep.mubr.f32.mxu1 %v313_v7 }
  0xda   : > { %1194 = vmatmul.mubr.f32.gmra.mxu0 %v310_v8  ;;  %1355 = vmatmul.mubr.f32.gmra.mxu1 %v312_v9  ;;  %v314_v9 = vld [vmem:[%s3830_s1 + $0x2c8] sm:$0xff] }
  0xdb   : > { %2295 = vmatprep.subr.mxu1 %v3004_v44  ;;  %1415 = vmatprep.subr.mxu0 %v638_v10  ;;  %v367_v44 = vld [vmem:[%s3830_s1 + $0x470] sm:$0xff] }
  0xdc   : > { %715 = vperm.xlu1 %2334, %v665_v11   ;;  %2311 = vmatpush1.msra.mxu1 %v3018_v48  ;;  %v625_v48 = vld [vmem:[%s2427_s27 + $0x800] sm:$0xff]  ;;  %s2225_s27 = sshll.u32 %s3898_s19, 7 }
  0xdd   : > { %1416 = vmatpush1.msra.mxu0 %v637_v12  ;;  %1199 = vmatprep.mubr.f32.mxu0 %v320_v13  ;;  %s3752_s7 = scalar_lea.vmem %s3834_s5, %s2225_s27 }
  0xde   : > { %1360 = vmatprep.mubr.f32.mxu1 %v322_v14  ;;  %1200 = vmatmul.mubr.f32.gmra.mxu0 %v319_v15 }
  0xdf   : > { %1361 = vmatmul.mubr.f32.gmra.mxu1 %v321_v16  ;;  %2296 = vmatprep.subr.mxu1 %v3028_v51  ;;  %v2376_v51 = vmov 0.0  }
  0xe0   : > { %1417 = vmatprep.subr.mxu0 %v636_v17  ;;  %2312 = vmatpush1.msra.mxu1 %v3044_v55  ;;  %v359_v55 = vld [vmem:[%s3830_s1 + $0x430] sm:$0xff] }
  0xe1   : > { %1418 = vmatpush1.msra.mxu0 %v635_v18  ;;  %1205 = vmatprep.mubr.f32.mxu0 %v329_v19 }
  0xe2   : > { %1366 = vmatprep.mubr.f32.mxu1 %v331_v20  ;;  %1206 = vmatmul.mubr.f32.gmra.mxu0 %v328_v21 }
  0xe3   : > { %1367 = vmatmul.mubr.f32.gmra.mxu1 %v330_v22  ;;  %2297 = vmatprep.subr.mxu1 %v3061_v60 }
  0xe4   : > { %1419 = vmatprep.subr.mxu0 %v634_v23  ;;  %2313 = vmatpush1.msra.mxu1 %v3068_v62 }
  0xe5   : > { %1420 = vmatpush1.msra.mxu0 %v633_v24  ;;  %1211 = vmatprep.mubr.f32.mxu0 %v338_v25 }
  0xe6   : > { %1372 = vmatprep.mubr.f32.mxu1 %v340_v26  ;;  %1212 = vmatmul.mubr.f32.gmra.mxu0 %v337_v27 }
  0xe7   : > { %1373 = vmatmul.mubr.f32.gmra.mxu1 %v339_v28  ;;  %2298 = vmatprep.subr.mxu1 %v3086_v3 }
  0xe8   : > { %1421 = vmatprep.subr.mxu0 %v632_v29  ;;  %2314 = vmatpush1.msra.mxu1 %v3092_v5 }
  0xe9   : > { %1422 = vmatpush1.msra.mxu0 %v631_v30  ;;  %2299 = vmatprep.subr.mxu1 %v638_v10 }
  0xea   : > { %1217 = vmatprep.mubr.f32.mxu0 %v347_v31  ;;  %1378 = vmatprep.mubr.f32.mxu1 %v349_v32 }
  0xeb   : > { %2315 = vmatpush1.msra.mxu1 %v637_v12  ;;  %1218 = vmatmul.mubr.f32.gmra.mxu0 %v346_v33  ;;  %v323_v12 = vld [vmem:[%s3830_s1 + $0x310] sm:$0xff] }
  0xec   : > { %1379 = vmatmul.mubr.f32.gmra.mxu1 %v348_v34  ;;  %2300 = vmatprep.subr.mxu1 %v636_v17  ;;  %v332_v17 = vld [vmem:[%s3830_s1 + $0x358] sm:$0xff] }
  0xed   : > { %1423 = vmatprep.subr.mxu0 %v630_v35  ;;  %2316 = vmatpush1.msra.mxu1 %v635_v18 }
  0xee   : > { %1424 = vmatpush1.msra.mxu0 %v629_v36  ;;  %2301 = vmatprep.subr.mxu1 %v634_v23 }
  0xef   : > { %1223 = vmatprep.mubr.f32.mxu0 %v356_v37  ;;  %1384 = vmatprep.mubr.f32.mxu1 %v358_v38 }
  0xf0   : > { %2317 = vmatpush1.msra.mxu1 %v633_v24  ;;  %1224 = vmatmul.mubr.f32.gmra.mxu0 %v355_v39 }
  0xf1   : > { %1385 = vmatmul.mubr.f32.gmra.mxu1 %v357_v40  ;;  %2302 = vmatprep.subr.mxu1 %v632_v29 }
  0xf2   : > { %1425 = vmatprep.subr.mxu0 %v628_v41  ;;  %2318 = vmatpush1.msra.mxu1 %v631_v30 }
  0xf3   : > { %1426 = vmatpush1.msra.mxu0 %v627_v42  ;;  %2303 = vmatprep.subr.mxu1 %v630_v35 }
  0xf4   : > { %1229 = vmatprep.mubr.f32.mxu0 %v365_v43  ;;  %1390 = vmatprep.mubr.f32.mxu1 %v367_v44 }
  0xf5   : > { %2319 = vmatpush1.msra.mxu1 %v629_v36  ;;  %1230 = vmatmul.mubr.f32.gmra.mxu0 %v364_v45 }
  0xf6   : > { %1391 = vmatmul.mubr.f32.gmra.mxu1 %v366_v46  ;;  %2304 = vmatprep.subr.mxu1 %v628_v41 }
  0xf7   : > { %1427 = vmatprep.subr.mxu0 %v626_v47  ;;  %2320 = vmatpush1.msra.mxu1 %v627_v42 }
  0xf8   : > { %1428 = vmatpush1.msra.mxu0 %v625_v48  ;;  %2305 = vmatprep.subr.mxu1 %v626_v47 }
  0xf9   : > { %1461 = vmatprep.mubr.f32.mxu0 %v2376_v51  ;;  %2321 = vmatpush1.msra.mxu1 %v625_v48 }
  0xfa   : > { %1533 = vmatprep.mubr.f32.mxu1 %v2376_v51  ;;  %1462 = vmatmul.mubr.f32.vlgmr.msra.gmra.mxu0 %v233_v49 }
  0xfb   : > { %1534 = vmatmul.mubr.f32.vlgmr.msra.gmra.mxu1 %v341_v50  ;;  %1467 = vmatprep.mubr.f32.mxu0 %v2376_v51 }
  0xfc   : > { %1539 = vmatprep.mubr.f32.mxu1 %v2376_v51 }
  0xfe   : > { %1468 = vmatmul.mubr.f32.gmra.mxu0 %v242_v52 }
  0xff   : > { %1540 = vmatmul.mubr.f32.gmra.mxu1 %v350_v53  ;;  %1473 = vmatprep.mubr.f32.mxu0 %v2376_v51 }
 0x100   : > { %1545 = vmatprep.mubr.f32.mxu1 %v2376_v51 }
 0x102   : > { %1474 = vmatmul.mubr.f32.gmra.mxu0 %v251_v54 }
 0x103   : > { %1546 = vmatmul.mubr.f32.gmra.mxu1 %v359_v55  ;;  %1479 = vmatprep.mubr.f32.mxu0 %v2376_v51 }
 0x104   : > { %1551 = vmatprep.mubr.f32.mxu1 %v2376_v51 }
 0x106   : > { %1480 = vmatmul.mubr.f32.gmra.mxu0 %v260_v56 }
 0x107   : > { %1552 = vmatmul.mubr.f32.gmra.mxu1 %v368_v57  ;;  %1485 = vmatprep.mubr.f32.mxu0 %v2376_v51 }
 0x10a   : > { %1486 = vmatmul.mubr.f32.gmra.mxu0 %v269_v58 }
 0x10b   : > { %1491 = vmatprep.mubr.f32.mxu0 %v2376_v51  ;;  %v3237_v60 = vpop.permute.xlu0 %710 }
 0x10e   : > { %1492 = vmatmul.mubr.f32.gmra.mxu0 %v278_v59 }
 0x10f   : > { %1497 = vmatprep.mubr.f32.mxu0 %v2376_v51 }
 0x112   : > { %1498 = vmatmul.mubr.f32.gmra.mxu0 %v287_v61  ;;  %v3242_v62 = vpop.f32.mrf.mxu0  ;;  %v3249_v1 = vpop.permute.xlu0 %750 }
 0x113   : > { %v3244_v63 = vpop.f32.mrf.mxu1  ;;  %1503 = vmatprep.mubr.f32.mxu0 %v2376_v51 }
 0x114   : > { %v821_v2 = vpop.f32.mrf.mxu0 }
 0x115   : > { %v3251_v3 = vpop.f32.mrf.mxu1 }
 0x116   : > { %1504 = vmatmul.mubr.f32.gmra.mxu0 %v296_v0 }
 0x117   : > { %1509 = vmatprep.mubr.f32.mxu0 %v2376_v51 }
 0x118   : > { %v825_v5 = vpop.f32.mrf.mxu0  ;;  %v701_v6 = vpop.permute.xlu0 %700 }
 0x119   : > { %v986_v7 = vpop.f32.mrf.mxu1 }
 0x11a   : > { %1510 = vmatmul.mubr.f32.gmra.mxu0 %v305_v4  ;;  %v827_v8 = vpop.f32.mrf.mxu0 }
 0x11b   : > { %1515 = vmatprep.mubr.f32.mxu0 %v2376_v51  ;;  %v988_v10 = vpop.f32.mrf.mxu1 }
 0x11e   : > { %1516 = vmatmul.mubr.f32.gmra.mxu0 %v314_v9  ;;  %v831_v11 = vpop.f32.mrf.mxu0 }
 0x11f   : > { %1521 = vmatprep.mubr.f32.mxu0 %v2376_v51  ;;  %v696_v13 = vpop.permute.xlu0 %695  ;;  %v992_v14 = vpop.f32.mrf.mxu1 }
 0x120   : > { %v833_v15 = vpop.f32.mrf.mxu0 }
 0x121   : > { %v994_v16 = vpop.f32.mrf.mxu1 }
 0x122   : > { %1522 = vmatmul.mubr.f32.gmra.mxu0 %v323_v12 }
 0x123   : > { %1527 = vmatprep.mubr.f32.mxu0 %v2376_v51 }
 0x124   : > { %v837_v18 = vpop.f32.mrf.mxu0 }
 0x125   : > { %v998_v19 = vpop.f32.mrf.mxu1  ;;  %v691_v20 = vpop.permute.xlu0 %690 }
 0x126   : > { %1528 = vmatmul.mubr.f32.gmra.mxu0 %v332_v17  ;;  %v838_v21 = vadd.f32 %v837_v18, %v691_v20  ;;  %v839_v22 = vpop.f32.mrf.mxu0 }
 0x127   : > { %v1000_v23 = vpop.f32.mrf.mxu1  ;;  %v840_v24 = vadd.f32 %v839_v22, %v691_v20 }
 0x128   : > { %v3265_v25 = vadd.f32 %v998_v19, %v838_v21 }
 0x129   : > { %v3267_v26 = vadd.f32 %v1000_v23, %v840_v24 }
 0x12a   : > { %v843_v27 = vpop.f32.mrf.mxu0 }
 0x12b   : > { %v1004_v28 = vpop.f32.mrf.mxu1  ;;  %v844_v30 = vadd.f32 %v843_v27, %v696_v13 }
 0x12c   : > { %v686_v29 = vpop.permute.xlu0 %685  ;;  %v845_v33 = vpop.f32.mrf.mxu0 }
 0x12d   : > { %v832_v31 = vadd.f32 %v831_v11, %v686_v29  ;;  %v834_v32 = vadd.f32 %v833_v15, %v686_v29  ;;  %v1006_v34 = vpop.f32.mrf.mxu1  ;;  %v3269_v35 = vadd.f32 %v1004_v28, %v844_v30  ;;  %v846_v36 = vadd.f32 %v845_v33, %v696_v13 }
 0x12f   : > { %v3271_v37 = vadd.f32 %v992_v14, %v832_v31  ;;  %v3273_v38 = vadd.f32 %v994_v16, %v834_v32  ;;  %v3275_v39 = vadd.f32 %v1006_v34, %v846_v36 }
 0x130   : > { %v849_v40 = vpop.f32.mrf.mxu0 }
 0x131   : > { %v1010_v41 = vpop.f32.mrf.mxu1  ;;  %v850_v43 = vadd.f32 %v849_v40, %v701_v6 }
 0x132   : > { %v681_v42 = vpop.permute.xlu0 %680  ;;  %v851_v46 = vpop.f32.mrf.mxu0 }
 0x133   : > { %v826_v44 = vadd.f32 %v825_v5, %v681_v42  ;;  %v828_v45 = vadd.f32 %v827_v8, %v681_v42  ;;  %v1012_v47 = vpop.f32.mrf.mxu1  ;;  %v3277_v48 = vadd.f32 %v1010_v41, %v850_v43  ;;  %v852_v49 = vadd.f32 %v851_v46, %v701_v6 }
 0x135   : > { %v3279_v50 = vadd.f32 %v986_v7, %v826_v44  ;;  %v3281_v51 = vadd.f32 %v988_v10, %v828_v45  ;;  %v3283_v53 = vadd.f32 %v1012_v47, %v852_v49 }
 0x136   : > { %v676_v52 = vpop.permute.xlu0 %675  ;;  %v855_v56 = vpop.f32.mrf.mxu0 }
 0x137   : > { %v820_v54 = vadd.f32 %v3242_v62, %v676_v52  ;;  %v822_v55 = vadd.f32 %v821_v2, %v676_v52  ;;  %v1016_v57 = vpop.f32.mrf.mxu1 }
 0x138   : > { %v706_v58 = vpop.permute.xlu1 %705  ;;  %v857_v4 = vpop.f32.mrf.mxu0 }
 0x139   : > { %v3287_v59 = vadd.f32 %v3244_v63, %v820_v54  ;;  %v3290_v61 = vadd.f32 %v3251_v3, %v822_v55  ;;  %v856_v0 = vadd.f32 %v855_v56, %v706_v58  ;;  %v1018_v5 = vpop.f32.mrf.mxu1  ;;  %v858_v6 = vadd.f32 %v857_v4, %v706_v58 }
 0x13b   : > { %v3292_v7 = vadd.f32 %v1016_v57, %v856_v0  ;;  %v3296_v9 = vadd.f32 %v1018_v5, %v858_v6 }
 0x13c   : > { %v3294_v8 = vpop.permute.xlu1 %745  ;;  %v861_v62 = vpop.f32.mrf.mxu0 }
 0x13d   : > { %v1022_v2 = vpop.f32.mrf.mxu1  ;;  %v862_v10 = vadd.f32 %v861_v62, %v3237_v60 }
 0x13e   : > { %v863_v11 = vpop.f32.mrf.mxu0 }
 0x13f   : > { %v1024_v63 = vpop.f32.mrf.mxu1  ;;  %v3299_v13 = vadd.f32 %v1022_v2, %v862_v10  ;;  %v864_v3 = vadd.f32 %v863_v11, %v3237_v60 }
 0x140   : > { %v741_v12 = vpop.permute.xlu1 %740 }
 0x141   : > { %v3302_v14 = vadd.f32 %v1024_v63, %v864_v3 }
 0x142   : > { %v867_v15 = vpop.f32.mrf.mxu0 }
 0x143   : > { %v1028_v16 = vpop.f32.mrf.mxu1 }
 0x144   : > { %v736_v17 = vpop.permute.xlu1 %735  ;;  %v869_v18 = vpop.f32.mrf.mxu0 }
 0x145   : > { %v1030_v19 = vpop.f32.mrf.mxu1 }
 0x148   : > { %v873_v20 = vpop.f32.mrf.mxu0  ;;  %v731_v22 = vpop.permute.xlu1 %730 }
 0x149   : > { %v1034_v21 = vpop.f32.mrf.mxu1 }
 0x14a   : > { %v875_v23 = vpop.f32.mrf.mxu0 }
 0x14b   : > { %v1036_v24 = vpop.f32.mrf.mxu1 }
 0x14e   : > { %v726_v27 = vpop.permute.xlu1 %725  ;;  %v879_v28 = vpop.f32.mrf.mxu0 }
 0x14f   : > { %v1040_v29 = vpop.f32.mrf.mxu1  ;;  %v880_v30 = vadd.f32 %v879_v28, %v726_v27 }
 0x150   : > { %v881_v31 = vpop.f32.mrf.mxu0 }
 0x151   : > { %v3304_v32 = vadd.f32 %v1040_v29, %v880_v30  ;;  %v882_v60 = vadd.f32 %v881_v31, %v726_v27  ;;  %v1042_v33 = vpop.f32.mrf.mxu1 }
 0x152   : > { %v721_v34 = vpop.permute.xlu1 %720 }
 0x153   : > { %v874_v36 = vadd.f32 %v873_v20, %v721_v34  ;;  %v876_v40 = vadd.f32 %v875_v23, %v721_v34  ;;  %v3306_v41 = vadd.f32 %v1042_v33, %v882_v60 }
 0x155   : > { %v885_v42 = vpop.f32.mrf.mxu0  ;;  %v3308_v43 = vadd.f32 %v1034_v21, %v874_v36  ;;  %v3310_v44 = vadd.f32 %v1036_v24, %v876_v40  ;;  %v1046_v46 = vpop.f32.mrf.mxu1 }
 0x156   : > { %v886_v45 = vadd.f32 %v885_v42, %v731_v22 }
 0x157   : > { %v716_v47 = vpop.permute.xlu1 %715  ;;  %v887_v49 = vpop.f32.mrf.mxu0 }
 0x158   : > { %v868_v52 = vadd.f32 %v867_v15, %v716_v47  ;;  %v870_v54 = vadd.f32 %v869_v18, %v716_v47  ;;  %v3312_v55 = vadd.f32 %v1046_v46, %v886_v45  ;;  %v888_v56 = vadd.f32 %v887_v49, %v731_v22  ;;  %v1048_v57 = vpop.f32.mrf.mxu1 }
 0x15a   : > { %v3314_v58 = vadd.f32 %v1028_v16, %v868_v52  ;;  %v3316_v0 = vadd.f32 %v1030_v19, %v870_v54  ;;  %v3318_v4 = vadd.f32 %v1048_v57, %v888_v56 }
 0x15b   : > { %v891_v5 = vpop.f32.mrf.mxu0 }
 0x15c   : > { %v1052_v6 = vpop.f32.mrf.mxu1  ;;  %v892_v62 = vadd.f32 %v891_v5, %v736_v17 }
 0x15d   : > { %v893_v2 = vpop.f32.mrf.mxu0 }
 0x15e   : > { %v3320_v10 = vadd.f32 %v1052_v6, %v892_v62  ;;  %v894_v11 = vadd.f32 %v893_v2, %v736_v17  ;;  %v1054_v63 = vpop.f32.mrf.mxu1 }
 0x160   : > { %v3322_v3 = vadd.f32 %v1054_v63, %v894_v11 }
 0x162   : > { %v897_v15 = vpop.f32.mrf.mxu0  ;;  %v1058_v20 = vpop.f32.mrf.mxu1 }
 0x163   : > { %v898_v18 = vadd.f32 %v897_v15, %v741_v12 }
 0x164   : > { %v899_v21 = vpop.f32.mrf.mxu0  ;;  %v1060_v22 = vpop.f32.mrf.mxu1 }
 0x165   : > { %v3324_v16 = vadd.f32 %v1058_v20, %v898_v18  ;;  %v900_v19 = vadd.f32 %v899_v21, %v741_v12 }
 0x167   : > { %v3326_v23 = vadd.f32 %v1060_v22, %v900_v19 }
 0x168   : > { %v903_v24 = vpop.f32.mrf.mxu0 }
 0x169   : > { %v1064_v27 = vpop.f32.mrf.mxu1  ;;  %v904_v28 = vadd.f32 %v903_v24, %v3294_v8 }
 0x16a   : > { %v905_v29 = vpop.f32.mrf.mxu0 }
 0x16b   : > { %v3329_v30 = vadd.f32 %v1064_v27, %v904_v28  ;;  %v906_v17 = vadd.f32 %v905_v29, %v3294_v8  ;;  %v1066_v31 = vpop.f32.mrf.mxu1 }
 0x16d   : > { %v3332_v60 = vadd.f32 %v1066_v31, %v906_v17 }
 0x16f   : > { %v909_v33 = vpop.f32.mrf.mxu0  ;;  %v1070_v36 = vpop.f32.mrf.mxu1 }
 0x170   : > { %v910_v34 = vadd.f32 %v909_v33, %v3249_v1 }
 0x171   : > { %v911_v12 = vpop.f32.mrf.mxu0  ;;  %v1072_v45 = vpop.f32.mrf.mxu1 }
 0x172   : > { %v3335_v40 = vadd.f32 %v1070_v36, %v910_v34  ;;  %v912_v42 = vadd.f32 %v911_v12, %v3249_v1 }
 0x174   : > { %v3338_v46 = vadd.f32 %v1072_v45, %v912_v42 }
 0x175   : > { %v1141_v47 = vpop.f32.mrf.mxu0 }
 0x176   : > { %v1302_v49 = vpop.f32.mrf.mxu1  ;;  %v1142_v52 = vadd.f32 %v1141_v47, %v3287_v59 }
 0x177   : > { %v1143_v8 = vpop.f32.mrf.mxu0 }
 0x178   : > { %v1304_v54 = vpop.f32.mrf.mxu1  ;;  %v3341_v56 = vadd.f32 %v1302_v49, %v1142_v52  ;;  %v1144_v57 = vadd.f32 %v1143_v8, %v3290_v61 }
 0x179   : > { %v1147_v5 = vpop.f32.mrf.mxu0 }
 0x17a   : > { %v1308_v6 = vpop.f32.mrf.mxu1  ;;  %v3344_v62 = vadd.f32 %v1304_v54, %v1144_v57  ;;  %v1148_v2 = vadd.f32 %v1147_v5, %v3279_v50 }
 0x17b   : > { %v1149_v1 = vpop.f32.mrf.mxu0 }
 0x17c   : > { %v1310_v11 = vpop.f32.mrf.mxu1  ;;  %v3347_v63 = vadd.f32 %v1308_v6, %v1148_v2  ;;  %v1150_v15 = vadd.f32 %v1149_v1, %v3281_v51 }
 0x17d   : > { %v1153_v18 = vpop.f32.mrf.mxu0 }
 0x17e   : > { %v1314_v59 = vpop.f32.mrf.mxu1  ;;  %v3350_v20 = vadd.f32 %v1310_v11, %v1150_v15  ;;  %v1154_v21 = vadd.f32 %v1153_v18, %v3271_v37 }
 0x17f   : > { %v1155_v19 = vpop.f32.mrf.mxu0 }
 0x180   : > { %v1316_v61 = vpop.f32.mrf.mxu1  ;;  %v3353_v22 = vadd.f32 %v1314_v59, %v1154_v21  ;;  %v1156_v24 = vadd.f32 %v1155_v19, %v3273_v38 }
 0x182   : > { %v1159_v27 = vpop.f32.mrf.mxu0  ;;  %v1320_v50 = vpop.f32.mrf.mxu1  ;;  %v3356_v28 = vadd.f32 %v1316_v61, %v1156_v24 }
 0x183   : > { %v1160_v29 = vadd.f32 %v1159_v27, %v3265_v25 }
 0x184   : > { %v1161_v17 = vpop.f32.mrf.mxu0  ;;  %v1322_v51 = vpop.f32.mrf.mxu1 }
 0x185   : > { %v3359_v31 = vadd.f32 %v1320_v50, %v1160_v29  ;;  %v1162_v33 = vadd.f32 %v1161_v17, %v3267_v26 }
 0x186   : > { %v1165_v34 = vpop.f32.mrf.mxu0  ;;  %v1326_v37 = vpop.f32.mrf.mxu1 }
 0x187   : > { %v3362_v36 = vadd.f32 %v1322_v51, %v1162_v33  ;;  %v1166_v12 = vadd.f32 %v1165_v34, %v3269_v35 }
 0x188   : > { %v1167_v42 = vpop.f32.mrf.mxu0  ;;  %v1328_v38 = vpop.f32.mrf.mxu1 }
 0x189   : > { %v3365_v45 = vadd.f32 %v1326_v37, %v1166_v12  ;;  %v1168_v47 = vadd.f32 %v1167_v42, %v3275_v39 }
 0x18a   : > { %v1171_v49 = vpop.f32.mrf.mxu0  ;;  %v1332_v25 = vpop.f32.mrf.mxu1 }
 0x18b   : > { %v3368_v52 = vadd.f32 %v1328_v38, %v1168_v47  ;;  %v1172_v8 = vadd.f32 %v1171_v49, %v3277_v48 }
 0x18c   : > { %v1173_v54 = vpop.f32.mrf.mxu0  ;;  %v1334_v26 = vpop.f32.mrf.mxu1 }
 0x18d   : > { %v3371_v57 = vadd.f32 %v1332_v25, %v1172_v8  ;;  %v1174_v5 = vadd.f32 %v1173_v54, %v3283_v53 }
 0x18e   : > { %v1177_v6 = vpop.f32.mrf.mxu0  ;;  %v1338_v35 = vpop.f32.mrf.mxu1 }
 0x18f   : > { %v3374_v2 = vadd.f32 %v1334_v26, %v1174_v5  ;;  %v1178_v1 = vadd.f32 %v1177_v6, %v3292_v7 }
 0x190   : > { %v3377_v11 = vpop.f32.mrf.mxu0  ;;  %v3379_v39 = vpop.f32.mrf.mxu1 }
 0x191   : > { %v3381_v15 = vadd.f32 %v1338_v35, %v1178_v1 }
 0x192   : > { %v1183_v18 = vpop.f32.mrf.mxu0  ;;  %v1344_v48 = vpop.f32.mrf.mxu1 }
 0x193   : > { %v1184_v59 = vadd.f32 %v1183_v18, %v3299_v13 }
 0x194   : > { %v3384_v21 = vpop.f32.mrf.mxu0  ;;  %v3386_v19 = vpop.f32.mrf.mxu1 }
 0x195   : > { %v3388_v53 = vadd.f32 %v1344_v48, %v1184_v59 }
 0x196   : > { %v1189_v61 = vpop.f32.mrf.mxu0  ;;  %v1350_v24 = vpop.f32.mrf.mxu1 }
 0x197   : > { %v1190_v7 = vadd.f32 %v1189_v61, %v3314_v58 }
 0x198   : > { %v1191_v27 = vpop.f32.mrf.mxu0  ;;  %v1352_v50 = vpop.f32.mrf.mxu1 }
 0x199   : > { %v3391_v29 = vadd.f32 %v1350_v24, %v1190_v7  ;;  %v1192_v17 = vadd.f32 %v1191_v27, %v3316_v0 }
 0x19a   : > { %v1195_v51 = vpop.f32.mrf.mxu0  ;;  %v1356_v34 = vpop.f32.mrf.mxu1 }
 0x19b   : > { %3862 = vst [vmem:[#allocation3_spill] sm:$0xff] %v3391_v29  ;;  %v3394_v33 = vadd.f32 %v1352_v50, %v1192_v17  ;;  %v1196_v13 = vadd.f32 %v1195_v51, %v3308_v43 }
 0x19c   : > { %v1197_v37 = vpop.f32.mrf.mxu0  ;;  %v1358_v38 = vpop.f32.mrf.mxu1 }
 0x19d   : > { %3863 = vst [vmem:[#allocation4_spill] sm:$0xff] %v3394_v33  ;;  %v3397_v12 = vadd.f32 %v1356_v34, %v1196_v13  ;;  %v1198_v42 = vadd.f32 %v1197_v37, %v3310_v44 }
 0x19e   : > { %v1201_v58 = vpop.f32.mrf.mxu0 }
 0x19f   : > { %3864 = vst [vmem:[#allocation5_spill] sm:$0xff] %v3397_v12  ;;  %v3400_v47 = vadd.f32 %v1358_v38, %v1198_v42  ;;  %v1362_v49 = vpop.f32.mrf.mxu1  ;;  %v1202_v25 = vadd.f32 %v1201_v58, %v3304_v32 }
 0x1a0   : > { %v3403_v8 = vpop.f32.mrf.mxu0 }
 0x1a1   : > { %3865 = vst [vmem:[#allocation6_spill] sm:$0xff] %v3400_v47  ;;  %v3405_v0 = vpop.f32.mrf.mxu1  ;;  %v3407_v54 = vadd.f32 %v1362_v49, %v1202_v25 }
 0x1a2   : > { %v1207_v43 = vpop.f32.mrf.mxu0 }
 0x1a3   : > { %v1368_v26 = vpop.f32.mrf.mxu1  ;;  %v1208_v5 = vadd.f32 %v1207_v43, %v3312_v55 }
 0x1a4   : > { %v3410_v6 = vpop.f32.mrf.mxu0 }
 0x1a5   : > { %v3412_v44 = vpop.f32.mrf.mxu1  ;;  %v3414_v35 = vadd.f32 %v1368_v26, %v1208_v5 }
 0x1a6   : > { %v1213_v1 = vpop.f32.mrf.mxu0 }
 0x1a7   : > { %v1374_v18 = vpop.f32.mrf.mxu1  ;;  %v1214_v34 = vadd.f32 %v1213_v1, %v3320_v10 }
 0x1a8   : > { %v1215_v48 = vpop.f32.mrf.mxu0 }
 0x1a9   : > { %v1376_v32 = vpop.f32.mrf.mxu1  ;;  %v1216_v37 = vadd.f32 %v1215_v48, %v3322_v3  ;;  %v1375_v58 = vadd.f32 %v1374_v18, %v1214_v34 }
 0x1ab   : > { %v1219_v59 = vpop.f32.mrf.mxu0  ;;  %v1377_v26 = vadd.f32 %v1376_v32, %v1216_v37 }
 0x1ac   : > { %v1380_v61 = vpop.f32.mrf.mxu1  ;;  %v1220_v49 = vadd.f32 %v1219_v59, %v3324_v16 }
 0x1ad   : > { %v1221_v24 = vpop.f32.mrf.mxu0 }
 0x1ae   : > { %v1382_v7 = vpop.f32.mrf.mxu1  ;;  %v1222_v5 = vadd.f32 %v1221_v24, %v3326_v23  ;;  %v1381_v10 = vadd.f32 %v1380_v61, %v1220_v49 }
 0x1b0   : > { %v1225_v27 = vpop.f32.mrf.mxu0  ;;  %v1383_v16 = vadd.f32 %v1382_v7, %v1222_v5 }
 0x1b1   : > { %v1386_v50 = vpop.f32.mrf.mxu1  ;;  %v1226_v3 = vadd.f32 %v1225_v27, %v3329_v30 }
 0x1b2   : > { %v1227_v17 = vpop.f32.mrf.mxu0 }
 0x1b3   : > { %v1388_v51 = vpop.f32.mrf.mxu1  ;;  %v1228_v48 = vadd.f32 %v1227_v17, %v3332_v60  ;;  %v1387_v30 = vadd.f32 %v1386_v50, %v1226_v3 }
 0x1b5   : > { %v1231_v13 = vpop.f32.mrf.mxu0  ;;  %v1389_v7 = vadd.f32 %v1388_v51, %v1228_v48 }
 0x1b6   : > { %v1392_v55 = vpop.f32.mrf.mxu1 }
 0x1b7   : > { %v1233_v42 = vpop.f32.mrf.mxu0 }
 0x1b8   : > { %v1394_v38 = vpop.f32.mrf.mxu1  ;;  %v1234_v17 = vadd.f32 %v1233_v42, %v3338_v46 }
 0x1ba   : > { %v3419_v25 = vpop.f32.mrf.mxu0  ;;  %v1395_v46 = vadd.f32 %v1394_v38, %v1234_v17 }
 0x1bb   : > { %v1535_v43 = vpop.f32.mrf.mxu1 }
 0x1bc   : > { %v3422_v29 = vadd.f32 %v1535_v43, %v1375_v58  ;;  %v3424_v33 = vpop.f32.mrf.mxu0 }
 0x1bd   : > { %v1537_v12 = vpop.f32.mrf.mxu1 }
 0x1be   : > { %v3426_v47 = vadd.f32 %v1537_v12, %v1377_v26  ;;  %v3429_v1 = vpop.f32.mrf.mxu0  ;;  %v3850_v23 = vmax.f32 %v3422_v29, 0.0  ;;  %v1232_v12 = vadd.f32 %v1231_v13, %v3335_v40 }
 0x1bf   : > { %v1541_v18 = vpop.f32.mrf.mxu1 }
 0x1c0   : > { %v3849_v32 = vmax.f32 %v3426_v47, 0.0  ;;  %v3434_v59 = vadd.f32 %v1541_v18, %v1381_v10  ;;  %v3436_v24 = vpop.f32.mrf.mxu0  ;;  %v1393_v50 = vadd.f32 %v1392_v55, %v1232_v12 }
 0x1c1   : > { %v1543_v34 = vpop.f32.mrf.mxu1 }
 0x1c2   : > { %v3439_v61 = vadd.f32 %v1543_v34, %v1383_v16  ;;  %v1475_v27 = vpop.f32.mrf.mxu0  ;;  %v1658_v60 = vadd.f32 %v3849_v32, %v3850_v23  ;;  %v3846_v49 = vmax.f32 %v3434_v59, 0.0 }
 0x1c3   : > { %v1547_v37 = vpop.f32.mrf.mxu1 }
 0x1c4   : > { %v3845_v58 = vmax.f32 %v3439_v61, 0.0  ;;  %v3448_v43 = vadd.f32 %v1547_v37, %v1387_v30  ;;  %1659 = vadd.xlane.f32.xlu0 %v1658_v60  ;;  %v1477_v40 = vpop.f32.mrf.mxu0 }
 0x1c5   : > { %v1549_v13 = vpop.f32.mrf.mxu1 }
 0x1c6   : > { %v3450_v26 = vadd.f32 %v1549_v13, %v1389_v7  ;;  %v1481_v5 = vpop.f32.mrf.mxu0  ;;  %v1661_v51 = vadd.f32 %v3845_v58, %v3846_v49  ;;  %v3840_v18 = vmax.f32 %v3448_v43, 0.0 }
 0x1c7   : > { %v1553_v10 = vpop.f32.mrf.mxu1  ;;  %v3470_v30 = vadd.f32 %v1481_v5, %v3359_v31  ;;  %v1180_v31 = vadd.f32 %v3377_v11, %v3296_v9  ;;  %v1186_v9 = vadd.f32 %v3384_v21, %v3302_v14 }
 0x1c8   : > { %v3839_v42 = vmax.f32 %v3450_v26, 0.0  ;;  %v3457_v3 = vadd.f32 %v1553_v10, %v1393_v50  ;;  %1662 = vadd.xlane.f32.xlu0 %v1661_v51  ;;  %v1483_v16 = vpop.f32.mrf.mxu0 }
 0x1c9   : > { %v1555_v48 = vpop.f32.mrf.mxu1  ;;  %v3461_v55 = vadd.f32 %v1483_v16, %v3362_v36  ;;  %v3856_v5 = vmax.f32 %v3470_v30, 0.0 }
 0x1ca   : > { %v3463_v34 = vadd.f32 %v1555_v48, %v1395_v46  ;;  %v1487_v12 = vpop.f32.mrf.mxu0  ;;  %v1664_v38 = vadd.f32 %v3839_v42, %v3840_v18  ;;  %v3836_v37 = vmax.f32 %v3457_v3, 0.0  ;;  %v1341_v48 = vadd.f32 %v3379_v39, %v1180_v31 }
 0x1cb   : > { %v3855_v36 = vmax.f32 %v3461_v55, 0.0  ;;  %v3486_v10 = vadd.f32 %v1487_v12, %v3365_v45  ;;  %v3518_v39 = vadd.f32 %v1475_v27, %v3353_v22  ;;  %v3528_v31 = vadd.f32 %v3436_v24, %v3350_v20 }
 0x1cc   : > { %v3835_v60 = vmax.f32 %v3463_v34, 0.0  ;;  %1665 = vadd.xlane.f32.xlu0 %v1664_v38  ;;  %v1489_v7 = vpop.f32.mrf.mxu0  ;;  %v3543_v20 = vadd.f32 %v3429_v1, %v3347_v63 }
 0x1cd   : > { %v3476_v17 = vadd.f32 %v1489_v7, %v3368_v52  ;;  %v1631_v16 = vadd.f32 %v3855_v36, %v3856_v5  ;;  %v3848_v45 = vmax.f32 %v3486_v10, 0.0  ;;  %v3507_v7 = vadd.f32 %v1477_v40, %v3356_v28 }
 0x1ce   : > { %v1667_v13 = vadd.f32 %v3835_v60, %v3836_v37  ;;  %v1493_v50 = vpop.f32.mrf.mxu0  ;;  %v3852_v24 = vmax.f32 %v3518_v39, 0.0 }
 0x1cf   : > { %v3847_v46 = vmax.f32 %v3476_v17, 0.0  ;;  %v3501_v12 = vadd.f32 %v1493_v50, %v3371_v57  ;;  %v1347_v57 = vadd.f32 %v3386_v19, %v1186_v9  ;;  %v3851_v19 = vmax.f32 %v3507_v7, 0.0 }
 0x1d0   : > { %1668 = vadd.xlane.f32.xlu1 %v1667_v13  ;;  %v1495_v51 = vpop.f32.mrf.mxu0 }
 0x1d1   : > { %v3490_v52 = vadd.f32 %v1495_v51, %v3374_v2  ;;  %v1634_v14 = vadd.f32 %v3847_v46, %v3848_v45  ;;  %v3844_v21 = vmax.f32 %v3501_v12, 0.0  ;;  %v1628_v1 = vadd.f32 %v3851_v19, %v3852_v24 }
 0x1d2   : > { %v1499_v11 = vpop.f32.mrf.mxu0 }
 0x1d3   : > { %v3504_v38 = vadd.f32 %v1499_v11, %v3381_v15  ;;  %v3843_v13 = vmax.f32 %v3490_v52, 0.0 }
 0x1d4   : > { %1632 = vadd.xlane.f32.xlu1 %v1631_v16  ;;  %v1501_v2 = vpop.f32.mrf.mxu0 }
 0x1d5   : > { %v3510_v51 = vadd.f32 %v1501_v2, %v1341_v48  ;;  %v3842_v28 = vmax.f32 %v3504_v38, 0.0 }
 0x1d6   : > { %v1505_v15 = vpop.f32.mrf.mxu0 }
 0x1d7   : > { %v3841_v40 = vmax.f32 %v3510_v51, 0.0  ;;  %v3524_v50 = vadd.f32 %v1505_v15, %v3388_v53  ;;  %v1637_v53 = vadd.f32 %v3843_v13, %v3844_v21 }
 0x1d8   : > { %1635 = vadd.xlane.f32.xlu1 %v1634_v14  ;;  %v1507_v16 = vpop.f32.mrf.mxu0  ;;  %v3550_v14 = vadd.f32 %v3424_v33, %v3344_v62  ;;  %v3565_v62 = vadd.f32 %v3419_v25, %v3341_v56  ;;  %v1560_v33 = vmax.f32 %v3543_v20, 0.0 }
 0x1d9   : > { %v3531_v22 = vadd.f32 %v1507_v16, %v1347_v57  ;;  %v1640_v27 = vadd.f32 %v3841_v40, %v3842_v28  ;;  %v3838_v11 = vmax.f32 %v3524_v50, 0.0  ;;  %v1561_v57 = vmax.f32 %v3528_v31, 0.0 }
 0x1da   : > { %v1511_v9 = vpop.f32.mrf.mxu0  ;;  %v1204_v16 = vadd.f32 %v3403_v8, %v3306_v41  ;;  %v1210_v41 = vadd.f32 %v3410_v6, %v3318_v4  ;;  %v1558_v56 = vmax.f32 %v3565_v62, 0.0  ;;  %v3870_v31 = vmax.f32 %v3550_v14, 0.0 }
 0x1db   : > { %v3837_v48 = vmax.f32 %v3531_v22, 0.0  ;;  %1641 = vadd.xlane.f32.xlu0 %v1640_v27  ;;  %v1625_v60 = vadd.f32 %v1561_v57, %v1560_v33 }
 0x1dc   : > { %1638 = vadd.xlane.f32.xlu1 %v1637_v53  ;;  %v1513_v2 = vpop.f32.mrf.mxu0  ;;  %v3861_v53 = vmax.f32 %v3550_v14, 0.0 }
 0x1dd   : > { %v1643_v63 = vadd.f32 %v3837_v48, %v3838_v11  ;;  %v1365_v48 = vadd.f32 %v3405_v0, %v1204_v16  ;;  %v1371_v0 = vadd.f32 %v3412_v44, %v1210_v41  ;;  %v3867_v44 = vld [vmem:[#allocation5_spill] sm:$0xff] }
 0x1de   : > { %v1517_v15 = vpop.f32.mrf.mxu0 }
 0x1df   : > { %1644 = vadd.xlane.f32.xlu0 %v1643_v63  ;;  %v3602_v41 = vadd.f32 %v1517_v15, %v3867_v44 }
 0x1e0   : > { %1629 = vadd.xlane.f32.xlu1 %v1628_v1  ;;  %v1519_v27 = vpop.f32.mrf.mxu0  ;;  %v1622_v1 = vadd.f32 %v3861_v53, %v1558_v56 }
 0x1e1   : > { %v1576_v15 = vmax.f32 %v3602_v41, 0.0 }
 0x1e2   : > { %v1523_v37 = vpop.f32.mrf.mxu0 }
 0x1e3   : > { %v3578_v8 = vadd.f32 %v1523_v37, %v3407_v54  ;;  %v3866_v37 = vld [vmem:[#allocation6_spill] sm:$0xff] }
 0x1e4   : > { %1626 = vadd.xlane.f32.xlu1 %v1625_v60  ;;  %v1525_v25 = vpop.f32.mrf.mxu0  ;;  %v3593_v60 = vadd.f32 %v1519_v27, %v3866_v37 }
 0x1e5   : > { %v3580_v63 = vadd.f32 %v1525_v25, %v1365_v48  ;;  %v3854_v16 = vmax.f32 %v3578_v8, 0.0 }
 0x1e6   : > { %v1529_v11 = vpop.f32.mrf.mxu0  ;;  %v1577_v27 = vmax.f32 %v3593_v60, 0.0 }
 0x1e7   : > { %v3853_v4 = vmax.f32 %v3580_v63, 0.0  ;;  %v3590_v6 = vadd.f32 %v1529_v11, %v3414_v35  ;;  %v3868_v11 = vld [vmem:[#allocation4_spill] sm:$0xff] }
 0x1e8   : > { %1623 = vadd.xlane.f32.xlu1 %v1622_v1  ;;  %v1531_v54 = vpop.f32.mrf.mxu0  ;;  %v3607_v1 = vadd.f32 %v1513_v2, %v3868_v11  ;;  %v1649_v2 = vadd.f32 %v1577_v27, %v1576_v15 }
 0x1e9   : > { %v3595_v48 = vadd.f32 %v1531_v54, %v1371_v0  ;;  %v1652_v25 = vadd.f32 %v3853_v4, %v3854_v16  ;;  %v3858_v42 = vmax.f32 %v3590_v6, 0.0  ;;  %v3869_v54 = vld [vmem:[#allocation3_spill] sm:$0xff]  ;;  %v3873_v62 = vmax.f32 %v3590_v6, 0.0 }
 0x1ea   : > { %v3615_v37 = vadd.f32 %v1511_v9, %v3869_v54  ;;  %v3859_v44 = vmax.f32 %v3607_v1, 0.0  ;;  %v1686_v9 = vld [vmem:[%s3832_s3] sm:$0xff]  ;;  %v3878_v6 = vmax.f32 %v3580_v63, 0.0 }
 0x1eb   : > { %v3857_v35 = vmax.f32 %v3595_v48, 0.0  ;;  %1653 = vadd.xlane.f32.xlu0 %v1652_v25  ;;  %2266 = vmatprep.mubr.msk.f32.mxu1 %vm1718_vm0, %v1686_v9  ;;  %v3874_v14 = vmax.f32 %v3595_v48, 0.0 }
 0x1ec   : > { %v3860_v25 = vmax.f32 %v3615_v37, 0.0 }
 0x1ed   : > { %v1655_v0 = vadd.f32 %v3857_v35, %v3858_v42 }
 0x1ee   : > { %v1646_v11 = vadd.f32 %v3859_v44, %v3860_v25 }
 0x1ef   : > { %1656 = vadd.xlane.f32.xlu0 %v1655_v0 }
 0x1f3   : > { %1650 = vadd.xlane.f32.xlu0 %v1649_v2 }
 0x1f7   : > { %1647 = vadd.xlane.f32.xlu0 %v1646_v11 }
 0x24d   : > { %v1660_v0 = vpop.xlane.xlu0 %1659 }
 0x251   : > { %v1663_v18 = vpop.xlane.xlu0 %1662 }
 0x255   : > { %v1666_v28 = vpop.xlane.xlu0 %1665 }
 0x259   : > { %v1669_v54 = vpop.xlane.xlu1 %1668 }
 0x25d   : > { %v1633_v40 = vpop.xlane.xlu1 %1632 }
 0x261   : > { %v1636_v13 = vpop.xlane.xlu1 %1635 }
 0x262   : > { %v1674_v32 = vadd.f32 %v1660_v0, %v1636_v13  ;;  %v1692_v0 = vld [vmem:[%s3832_s3 + $0x30] sm:$0xff] }
 0x264   : > { %v1642_v2 = vpop.xlane.xlu0 %1641  ;;  %v1682_v9 = vmul.f32 0.00390625, %v1674_v32 }
 0x265   : > { %v1639_v21 = vpop.xlane.xlu1 %1638  ;;  %v1676_v49 = vadd.f32 %v1666_v28, %v1642_v2  ;;  %v1694_v2 = vld [vmem:[%s3832_s3 + $0x40] sm:$0xff] }
 0x266   : > { %v1675_v45 = vadd.f32 %v1663_v18, %v1639_v21 }
 0x267   : > { %v1684_v23 = vmul.f32 0.00390625, %v1676_v49 }
 0x268   : > { %v1645_v58 = vpop.xlane.xlu0 %1644  ;;  %v1683_v19 = vmul.f32 0.00390625, %v1675_v45 }
 0x269   : > { %v1677_v46 = vadd.f32 %v1669_v54, %v1645_v58  ;;  %v1630_v24 = vpop.xlane.xlu1 %1629  ;;  %v1693_v54 = vld [vmem:[%s3832_s3 + $0x38] sm:$0xff] }
 0x26b   : > { %v1685_v11 = vmul.f32 0.00390625, %v1677_v46 }
 0x26d   : > { %2250 = vmatprep.subr.mxu1 %v1685_v11  ;;  %v1627_v58 = vpop.xlane.xlu1 %1626 }
 0x26e   : > { %2251 = vmatpush3.msra.mxu1 %v1685_v11  ;;  %v1695_v11 = vld [vmem:[%s3832_s3 + $0x48] sm:$0xff] }
 0x26f   : > { %2252 = vmatprep.subr.mxu1 %v1684_v23 }
 0x270   : > { %2253 = vmatpush3.msra.mxu1 %v1684_v23 }
 0x271   : > { %2254 = vmatprep.subr.mxu1 %v1683_v19  ;;  %v1624_v23 = vpop.xlane.xlu1 %1623 }
 0x272   : > { %2255 = vmatpush3.msra.mxu1 %v1683_v19 }
 0x273   : > { %2256 = vmatprep.subr.mxu1 %v1682_v9 }
 0x274   : > { %v1654_v4 = vpop.xlane.xlu0 %1653  ;;  %2257 = vmatpush3.msra.mxu1 %v1682_v9  ;;  %v1696_v9 = vld [vmem:[%s3832_s3 + $0x50] sm:$0xff] }
 0x275   : > { %v1672_v36 = vadd.f32 %v1654_v4, %v1630_v24  ;;  %v1689_v24 = vld [vmem:[%s3832_s3 + $0x18] sm:$0xff]  ;;  %v1691_v4 = vld [vmem:[%s3832_s3 + $0x28] sm:$0xff] }
 0x277   : > { %v1680_v13 = vmul.f32 0.00390625, %v1672_v36  ;;  %v1688_v36 = vld [vmem:[%s3832_s3 + $0x10] sm:$0xff] }
 0x278   : > { %v1657_v16 = vpop.xlane.xlu0 %1656 }
 0x279   : > { %v1673_v28 = vadd.f32 %v1657_v16, %v1633_v40  ;;  %v1687_v40 = vld [vmem:[%s3832_s3 + $0x8] sm:$0xff]  ;;  %v1690_v16 = vld [vmem:[%s3832_s3 + $0x20] sm:$0xff] }
 0x27b   : > { %v1681_v18 = vmul.f32 0.00390625, %v1673_v28  ;;  %v1697_v28 = vld [vmem:[%s3832_s3 + $0x58] sm:$0xff] }
 0x27c   : > { %v1651_v46 = vpop.xlane.xlu0 %1650 }
 0x27d   : > { %v1671_v49 = vadd.f32 %v1651_v46, %v1627_v58  ;;  %2258 = vmatprep.subr.mxu1 %v1681_v18  ;;  %v1698_v58 = vld [vmem:[%s3832_s3 + $0x60] sm:$0xff]  ;;  %v1700_v46 = vld [vmem:[%s3832_s3 + $0x70] sm:$0xff] }
 0x27e   : > { %2259 = vmatpush3.msra.mxu1 %v1681_v18  ;;  %v1699_v18 = vld [vmem:[%s3832_s3 + $0x68] sm:$0xff] }
 0x27f   : > { %v1679_v45 = vmul.f32 0.00390625, %v1671_v49  ;;  %2260 = vmatprep.subr.mxu1 %v1680_v13 }
 0x280   : > { %v1648_v32 = vpop.xlane.xlu0 %1647  ;;  %2261 = vmatpush3.msra.mxu1 %v1680_v13  ;;  %v1701_v13 = vld [vmem:[%s3832_s3 + $0x78] sm:$0xff] }
 0x281   : > { %v1670_v21 = vadd.f32 %v1648_v32, %v1624_v23  ;;  %2262 = vmatprep.subr.mxu1 %v1679_v45 }
 0x282   : > { %2263 = vmatpush3.msra.mxu1 %v1679_v45 }
 0x283   : > { %v1678_v19 = vmul.f32 0.00390625, %v1670_v21 }
 0x285   : > { %2264 = vmatprep.subr.mxu1 %v1678_v19 }
 0x286   : > { %2265 = vmatpush3.msra.mxu1 %v1678_v19 }
 0x287   : > { %2267 = vmatmul.mubr.msk.f32.vlgmr.msra.gmra.mxu1 %vm1718_vm0, %v1687_v40 }
 0x288   : > { %2269 = vmatprep.mubr.msk.f32.mxu1 %vm1718_vm0, %v1688_v36  ;;  %v1703_v36 = vld [vmem:[%s3833_s4 + $0x8] sm:$0xff] }
 0x28b   : > { %2270 = vmatmul.mubr.msk.f32.gmra.mxu1 %vm1718_vm0, %v1689_v24 }
 0x28c   : > { %2272 = vmatprep.mubr.msk.f32.mxu1 %vm1718_vm0, %v1690_v16  ;;  %v1711_v16 = vld [vmem:[%s3833_s4 + $0x48] sm:$0xff] }
 0x28f   : > { %2273 = vmatmul.mubr.msk.f32.gmra.mxu1 %vm1718_vm0, %v1691_v4  ;;  %v1702_v4 = vld [vmem:[%s3833_s4] sm:$0xff] }
 0x290   : > { %2275 = vmatprep.mubr.msk.f32.mxu1 %vm1718_vm0, %v1692_v0 }
 0x293   : > { %2276 = vmatmul.mubr.msk.f32.gmra.mxu1 %vm1718_vm0, %v1693_v54  ;;  %v1710_v54 = vld [vmem:[%s3833_s4 + $0x40] sm:$0xff] }
 0x294   : > { %2278 = vmatprep.mubr.msk.f32.mxu1 %vm1718_vm0, %v1694_v2 }
 0x297   : > { %2279 = vmatmul.mubr.msk.f32.gmra.mxu1 %vm1718_vm0, %v1695_v11 }
 0x298   : > { %2281 = vmatprep.mubr.msk.f32.mxu1 %vm1718_vm0, %v1696_v9  ;;  %v1705_v9 = vld [vmem:[%s3833_s4 + $0x18] sm:$0xff] }
 0x29b   : > { %2282 = vmatmul.mubr.msk.f32.gmra.mxu1 %vm1718_vm0, %v1697_v28 }
 0x29c   : > { %2284 = vmatprep.mubr.msk.f32.mxu1 %vm1718_vm0, %v1698_v58  ;;  %v1713_v58 = vld [vmem:[%s3833_s4 + $0x58] sm:$0xff] }
 0x29f   : > { %2285 = vmatmul.mubr.msk.f32.gmra.mxu1 %vm1718_vm0, %v1699_v18 }
 0x2a0   : > { %2287 = vmatprep.mubr.msk.f32.mxu1 %vm1718_vm0, %v1700_v46  ;;  %v1704_v46 = vld [vmem:[%s3833_s4 + $0x10] sm:$0xff] }
 0x2a3   : > { %2288 = vmatmul.mubr.msk.f32.gmra.mxu1 %vm1718_vm0, %v1701_v13 }
 0x347   : > { %v2268_v49 = vpop.f32.mrf.mxu1 }
 0x348   : > { %v1839_v2 = vadd.f32 %v2268_v49, %v1703_v36  ;;  %v1712_v49 = vld [vmem:[%s3833_s4 + $0x50] sm:$0xff] }
 0x349   : > { %v1833_v45 = vpop.f32.mrf.mxu1 }
 0x34a   : > { %v1834_v18 = vadd.f32 %v1833_v45, %v1702_v4 }
 0x34b   : > { %v2271_v23 = vpop.f32.mrf.mxu1 }
 0x34c   : > { %v1849_v36 = vadd.f32 %v2271_v23, %v1705_v9 }
 0x34d   : > { %v1843_v32 = vpop.f32.mrf.mxu1 }
 0x34e   : > { %v1844_v44 = vadd.f32 %v1843_v32, %v1704_v46  ;;  %v1708_v46 = vld [vmem:[%s3833_s4 + $0x30] sm:$0xff] }
 0x34f   : > { %v2274_v21 = vpop.f32.mrf.mxu1 }
 0x351   : > { %v1853_v19 = vpop.f32.mrf.mxu1 }
 0x353   : > { %v2277_v40 = vpop.f32.mrf.mxu1 }
 0x355   : > { %v1863_v24 = vpop.f32.mrf.mxu1 }
 0x357   : > { %v2280_v0 = vpop.f32.mrf.mxu1 }
 0x358   : > { %v1879_v11 = vadd.f32 %v2280_v0, %v1711_v16 }
 0x359   : > { %v1873_v28 = vpop.f32.mrf.mxu1 }
 0x35a   : > { %v1913_v13 = vsub.f32 %v1839_v2, %v1879_v11  ;;  %v1874_v5 = vadd.f32 %v1873_v28, %v1710_v54  ;;  %v1715_v2 = vld [vmem:[%s3833_s4 + $0x68] sm:$0xff]  ;;  %v1706_v54 = vld [vmem:[%s3833_s4 + $0x20] sm:$0xff] }
 0x35b   : > { %v2283_v35 = vpop.f32.mrf.mxu1  ;;  %v1854_v9 = vadd.f32 %v1853_v19, %v1706_v54  ;;  %v1709_v19 = vld [vmem:[%s3833_s4 + $0x38] sm:$0xff] }
 0x35c   : > { %v1922_v16 = vmul.f32 1.442695, %v1913_v13  ;;  %v1912_v0 = vsub.f32 %v1834_v18, %v1874_v5  ;;  %v1889_v42 = vadd.f32 %v2283_v35, %v1713_v58  ;;  %v1714_v5 = vld [vmem:[%s3833_s4 + $0x60] sm:$0xff]  ;;  %v1707_v35 = vld [vmem:[%s3833_s4 + $0x28] sm:$0xff]  ;;  %v1717_v13 = vld [vmem:[%s3833_s4 + $0x78] sm:$0xff] }
 0x35d   : > { %v1883_v25 = vpop.f32.mrf.mxu1  ;;  %v1859_v18 = vadd.f32 %v2274_v21, %v1707_v35 }
 0x35e   : > { %2335 = vpow2.f32 %v1922_v16  ;;  %v1920_v53 = vmul.f32 1.442695, %v1912_v0  ;;  %v1915_v45 = vsub.f32 %v1849_v36, %v1889_v42  ;;  %v1884_v4 = vadd.f32 %v1883_v25, %v1712_v49 }
 0x35f   : > { %v2286_v11 = vpop.f32.mrf.mxu1  ;;  %v1864_v16 = vadd.f32 %v1863_v24, %v1708_v46 }
 0x360   : > { %2337 = vpow2.f32 %v1920_v53  ;;  %v1926_v42 = vmul.f32 1.442695, %v1915_v45  ;;  %v1914_v25 = vsub.f32 %v1844_v44, %v1884_v4  ;;  %v1899_v23 = vadd.f32 %v2286_v11, %v1715_v2  ;;  %v1716_v53 = vld [vmem:[%s3833_s4 + $0x70] sm:$0xff] }
 0x361   : > { %v1893_v32 = vpop.f32.mrf.mxu1  ;;  %v1869_v2 = vadd.f32 %v2277_v40, %v1709_v19 }
 0x362   : > { %2339 = vpow2.f32 %v1926_v42  ;;  %v1924_v28 = vmul.f32 1.442695, %v1914_v25  ;;  %v1894_v58 = vadd.f32 %v1893_v32, %v1714_v5  ;;  %v1917_v21 = vsub.f32 %v1859_v18, %v1899_v23 }
 0x363   : > { %v2289_v49 = vpop.f32.mrf.mxu1 }
 0x364   : > { %2341 = vpow2.f32 %v1924_v28  ;;  %v1916_v44 = vsub.f32 %v1854_v9, %v1894_v58  ;;  %v1909_v45 = vadd.f32 %v2289_v49, %v1717_v13  ;;  %v1930_v11 = vmul.f32 1.442695, %v1917_v21 }
 0x365   : > { %v1903_v36 = vpop.f32.mrf.mxu1 }
 0x366   : > { %v1928_v0 = vmul.f32 1.442695, %v1916_v44  ;;  %v1904_v4 = vadd.f32 %v1903_v36, %v1716_v53  ;;  %v1919_v5 = vsub.f32 %v1869_v2, %v1909_v45 }
 0x368   : > { %2343 = vpow2.f32 %v1928_v0  ;;  %v1918_v54 = vsub.f32 %v1864_v16, %v1904_v4  ;;  %v1934_v28 = vmul.f32 1.442695, %v1919_v5 }
 0x36a   : > { %v1932_v35 = vmul.f32 1.442695, %v1918_v54 }
 0x36b   : > { %v2336_v42 = vpop.eup %2335 }
 0x36c   : > { %v1937_v25 = vadd.f32 1.0, %v2336_v42  ;;  %2345 = vpow2.f32 %v1932_v35 }
 0x36d   : > { %v2338_v32 = vpop.eup %2337  ;;  %2347 = vpow2.f32 %v1930_v11 }
 0x36e   : > { %2349 = vrcp.f32 %v1937_v25  ;;  %v1936_v9 = vadd.f32 1.0, %v2338_v32 }
 0x36f   : > { %v2340_v23 = vpop.eup %2339 }
 0x370   : > { %2351 = vrcp.f32 %v1936_v9  ;;  %v1939_v58 = vadd.f32 1.0, %v2340_v23 }
 0x371   : > { %v2342_v24 = vpop.eup %2341  ;;  %2353 = vpow2.f32 %v1934_v28 }
 0x372   : > { %v1938_v18 = vadd.f32 1.0, %v2342_v24  ;;  %2355 = vrcp.f32 %v1939_v58 }
 0x374   : > { %2357 = vrcp.f32 %v1938_v18 }
 0x375   : > { %v2344_v40 = vpop.eup %2343 }
 0x376   : > { %v1940_v46 = vadd.f32 1.0, %v2344_v40 }
 0x378   : > { %2359 = vrcp.f32 %v1940_v46 }
 0x379   : > { %v2346_v13 = vpop.eup %2345 }
 0x37a   : > { %v2348_v49 = vpop.eup %2347  ;;  %v1942_v44 = vadd.f32 1.0, %v2346_v13 }
 0x37b   : > { %v2350_v53 = vpop.eup %2349  ;;  %v1941_v36 = vadd.f32 1.0, %v2348_v49 }
 0x37c   : > { %2063 = vperm.xlu1 %2334, %v2350_v53   ;;  %v1961_v19 = vsub.f32 1.0, %v2350_v53  ;;  %2361 = vrcp.f32 %v1942_v44  ;;  %v3872_v53 = vmax.f32 %v3607_v1, 0.0  ;;  %v3876_v1 = vmax.f32 %v3461_v55, 0.0 }
 0x37d   : > { %v2352_v21 = vpop.eup %2351  ;;  %2363 = vrcp.f32 %v1941_v36  ;;  %v3880_v55 = vmax.f32 %v3507_v7, 0.0 }
 0x37e   : > { %1991 = vperm.xlu0 %2333, %v1961_v19   ;;  %v1960_v16 = vsub.f32 1.0, %v2352_v21  ;;  %v2354_v0 = vpop.eup %2353 }
 0x37f   : > { %v1943_v45 = vadd.f32 1.0, %v2354_v0  ;;  %v2356_v4 = vpop.eup %2355 }
 0x380   : > { %1986 = vperm.xlu1 %2334, %v1960_v16   ;;  %v1963_v54 = vsub.f32 1.0, %v2356_v4 }
 0x381   : > { %v2358_v2 = vpop.eup %2357  ;;  %2365 = vrcp.f32 %v1943_v45 }
 0x382   : > { %2058 = vperm.xlu0 %2333, %v2352_v21   ;;  %v1962_v5 = vsub.f32 1.0, %v2358_v2 }
 0x384   : > { %2073 = vperm.xlu1 %2334, %v2356_v4  }
 0x385   : > { %v2360_v11 = vpop.eup %2359 }
 0x386   : > { %2068 = vperm.xlu0 %2333, %v2358_v2   ;;  %v1964_v35 = vsub.f32 1.0, %v2360_v11 }
 0x388   : > { %2001 = vperm.xlu1 %2334, %v1963_v54  }
 0x389   : > { %v2362_v42 = vpop.eup %2361 }
 0x38a   : > { %2078 = vperm.xlu0 %2333, %v2360_v11   ;;  %v2364_v25 = vpop.eup %2363  ;;  %v1966_v32 = vsub.f32 1.0, %v2362_v42 }
 0x38b   : > { %v1965_v9 = vsub.f32 1.0, %v2364_v25 }
 0x38c   : > { %1996 = vperm.xlu1 %2334, %v1962_v5  }
 0x38e   : > { %2006 = vperm.xlu0 %2333, %v1964_v35   ;;  %v2366_v28 = vpop.eup %2365 }
 0x38f   : > { %v1967_v23 = vsub.f32 1.0, %v2366_v28 }
 0x390   : > { %2083 = vperm.xlu1 %2334, %v2364_v25  }
 0x392   : > { %2016 = vperm.xlu0 %2333, %v1966_v32  }
 0x394   : > { %2011 = vperm.xlu1 %2334, %v1965_v9  }
 0x396   : > { %2088 = vperm.xlu0 %2333, %v2362_v42   ;;  %v3877_v42 = vmax.f32 %v3578_v8, 0.0  ;;  %v3882_v8 = vmax.f32 %v3426_v47, 0.0  ;;  %v3885_v47 = vmax.f32 %v3434_v59, 0.0 }
 0x398   : > { %2021 = vperm.xlu1 %2334, %v1967_v23  }
 0x39c   : > { %2093 = vperm.xlu1 %2334, %v2366_v28   ;;  %v3881_v28 = vmax.f32 %v3422_v29, 0.0 }
 0x3f7   : > { %v2064_v24 = vpop.permute.xlu1 %2063 }
 0x3f8   : > { %v2098_v18 = vmul.f32 %v2064_v24, %v1576_v15  ;;  %v2099_v40 = vmul.f32 %v2064_v24, %v1577_v27 }
 0x3f9   : > { %v1992_v58 = vpop.permute.xlu0 %1991 }
 0x3fa   : > { %v2026_v46 = vmul.f32 %v1992_v58, %v1560_v33  ;;  %v2027_v13 = vmul.f32 %v1992_v58, %v1561_v57  ;;  %v3871_v33 = vmax.f32 %v3615_v37, 0.0  ;;  %v3875_v37 = vmax.f32 %v3470_v30, 0.0 }
 0x3fb   : > { %v1987_v41 = vpop.permute.xlu1 %1986  ;;  %v3879_v30 = vmax.f32 %v3518_v39, 0.0  ;;  %v3884_v39 = vmax.f32 %v3476_v17, 0.0  ;;  %v3887_v17 = vmax.f32 %v3501_v12, 0.0 }
 0x3fc   : > { %v2114_v15 = vadd.f32 %v2098_v18, %v2026_v46  ;;  %v2115_v49 = vadd.f32 %v2099_v40, %v2027_v13  ;;  %v2024_v20 = vmul.f32 %v1987_v41, %v1558_v56  ;;  %v2025_v57 = vmul.f32 %v1987_v41, %v3870_v31 }
 0x3fd   : > { %v2059_v60 = vpop.permute.xlu0 %2058  ;;  %v3883_v40 = vmax.f32 %v3486_v10, 0.0  ;;  %v3886_v10 = vmax.f32 %v3439_v61, 0.0  ;;  %v3891_v61 = vmax.f32 %v3448_v43, 0.0 }
 0x3fe   : > { %2130 = vst [vmem:[%s3752_s7 + $0x10] sm:$0xff] %v2114_v15  ;;  %2131 = vst [vmem:[%s3752_s7 + $0x18] sm:$0xff] %v2115_v49  ;;  %v2096_v27 = vmul.f32 %v2059_v60, %v3871_v33  ;;  %v2097_v44 = vmul.f32 %v2059_v60, %v3872_v53 }
 0x3ff   : > { %v2074_v19 = vpop.permute.xlu1 %2073 }
 0x400   : > { %v2112_v21 = vadd.f32 %v2096_v27, %v2024_v20  ;;  %v2113_v36 = vadd.f32 %v2097_v44, %v2025_v57  ;;  %v2102_v56 = vmul.f32 %v2074_v19, %v3873_v62  ;;  %v2103_v45 = vmul.f32 %v2074_v19, %v3874_v14 }
 0x401   : > { %v2069_v16 = vpop.permute.xlu0 %2068  ;;  %v3888_v57 = vmax.f32 %v3490_v52, 0.0  ;;  %v3889_v27 = vmax.f32 %v3504_v38, 0.0  ;;  %v3890_v44 = vmax.f32 %v3510_v51, 0.0 }
 0x402   : > { %2128 = vst [vmem:[%s3752_s7] sm:$0xff] %v2112_v21  ;;  %2129 = vst [vmem:[%s3752_s7 + $0x8] sm:$0xff] %v2113_v36  ;;  %v2100_v25 = vmul.f32 %v2069_v16, %v3877_v42  ;;  %v2101_v32 = vmul.f32 %v2069_v16, %v3878_v6 }
 0x403   : > { %v2002_v0 = vpop.permute.xlu1 %2001 }
 0x404   : > { %v2030_v4 = vmul.f32 %v2002_v0, %v3875_v37  ;;  %v2031_v2 = vmul.f32 %v2002_v0, %v3876_v1  ;;  %v3892_v0 = vmax.f32 %v3450_v26, 0.0  ;;  %v3895_v37 = vmax.f32 %v3457_v3, 0.0 }
 0x405   : > { %v2079_v54 = vpop.permute.xlu0 %2078 }
 0x406   : > { %v2118_v11 = vadd.f32 %v2102_v56, %v2030_v4  ;;  %v2119_v5 = vadd.f32 %v2103_v45, %v2031_v2  ;;  %v2104_v23 = vmul.f32 %v2079_v54, %v3881_v28  ;;  %v2105_v24 = vmul.f32 %v2079_v54, %v3882_v8 }
 0x407   : > { %v1997_v35 = vpop.permute.xlu1 %1996  ;;  %v3893_v56 = vmax.f32 %v3524_v50, 0.0  ;;  %v3894_v45 = vmax.f32 %v3531_v22, 0.0  ;;  %v3896_v4 = vmax.f32 %v3463_v34, 0.0 }
 0x408   : > { %2134 = vst [vmem:[%s3752_s7 + $0x30] sm:$0xff] %v2118_v11  ;;  %2135 = vst [vmem:[%s3752_s7 + $0x38] sm:$0xff] %v2119_v5  ;;  %v2028_v48 = vmul.f32 %v1997_v35, %v3879_v30  ;;  %v2029_v9 = vmul.f32 %v1997_v35, %v3880_v55 }
 0x409   : > { %v2007_v58 = vpop.permute.xlu0 %2006 }
 0x40a   : > { %v2116_v18 = vadd.f32 %v2100_v25, %v2028_v48  ;;  %v2117_v63 = vadd.f32 %v2101_v32, %v2029_v9  ;;  %v2032_v46 = vmul.f32 %v2007_v58, %v3883_v40  ;;  %v2033_v13 = vmul.f32 %v2007_v58, %v3884_v39 }
 0x40b   : > { %v2084_v41 = vpop.permute.xlu1 %2083 }
 0x40c   : > { %2132 = vst [vmem:[%s3752_s7 + $0x20] sm:$0xff] %v2116_v18  ;;  %2133 = vst [vmem:[%s3752_s7 + $0x28] sm:$0xff] %v2117_v63  ;;  %v2120_v7 = vadd.f32 %v2104_v23, %v2032_v46  ;;  %v2121_v15 = vadd.f32 %v2105_v24, %v2033_v13  ;;  %v2106_v60 = vmul.f32 %v2084_v41, %v3885_v47 }
 0x40d   : > { %v2017_v49 = vpop.permute.xlu0 %2016  ;;  %v2107_v20 = vmul.f32 %v2084_v41, %v3886_v10 }
 0x40e   : > { %2136 = vst [vmem:[%s3752_s7 + $0x40] sm:$0xff] %v2120_v7  ;;  %2137 = vst [vmem:[%s3752_s7 + $0x48] sm:$0xff] %v2121_v15  ;;  %v2036_v53 = vmul.f32 %v2017_v49, %v3889_v27  ;;  %v2037_v19 = vmul.f32 %v2017_v49, %v3890_v44 }
 0x40f   : > { %v2012_v29 = vpop.permute.xlu1 %2011 }
 0x410   : > { %v2034_v31 = vmul.f32 %v2012_v29, %v3887_v17  ;;  %v2035_v33 = vmul.f32 %v2012_v29, %v3888_v57 }
 0x411   : > { %v2089_v21 = vpop.permute.xlu0 %2088 }
 0x412   : > { %v2122_v59 = vadd.f32 %v2106_v60, %v2034_v31  ;;  %v2123_v36 = vadd.f32 %v2107_v20, %v2035_v33  ;;  %v2108_v16 = vmul.f32 %v2089_v21, %v3891_v61  ;;  %v2109_v12 = vmul.f32 %v2089_v21, %v3892_v0 }
 0x413   : > { %v2022_v62 = vpop.permute.xlu1 %2021 }
 0x414   : > { %2138 = vst [vmem:[%s3752_s7 + $0x50] sm:$0xff] %v2122_v59  ;;  %2139 = vst [vmem:[%s3752_s7 + $0x58] sm:$0xff] %v2123_v36  ;;  %v2124_v52 = vadd.f32 %v2108_v16, %v2036_v53  ;;  %v2125_v38 = vadd.f32 %v2109_v12, %v2037_v19  ;;  %v2038_v14 = vmul.f32 %v2022_v62, %v3893_v56 }
 0x415   : > { %v2039_v43 = vmul.f32 %v2022_v62, %v3894_v45 }
 0x416   : > { %2140 = vst [vmem:[%s3752_s7 + $0x60] sm:$0xff] %v2124_v52  ;;  %2141 = vst [vmem:[%s3752_s7 + $0x68] sm:$0xff] %v2125_v38 }
 0x417   : > { %v2094_v51 = vpop.permute.xlu1 %2093 }
 0x418   : > { %v2110_v26 = vmul.f32 %v2094_v51, %v3895_v37  ;;  %v2111_v1 = vmul.f32 %v2094_v51, %v3896_v4 }
 0x41a   : > { %v2126_v2 = vadd.f32 %v2110_v26, %v2038_v14  ;;  %v2127_v54 = vadd.f32 %v2111_v1, %v2039_v43 }
 0x41c   : > { %2142 = vst [vmem:[%s3752_s7 + $0x70] sm:$0xff] %v2126_v2  ;;  %2143 = vst [vmem:[%s3752_s7 + $0x78] sm:$0xff] %v2127_v54 }
 0x41d PF: > { %s15_s18 = sadd.s32 1, %s2373_s18  }
 0x41e   : > { %p12_p4 = scmp.ge.s32.totalorder %s15_s18, 4  }
 0x420   :  { %14 = sbr.rel (!%p12_p4) target bundleno = 1 (0x1), region = 70 }

</bundles_post_ra>
